<compile_context>
chip_gen: v6e
topology: v6e:2x2x1
jax: 0.10.0
libtpu: 0.0.40
codegen_flags: <defaults>
</compile_context>

<pallas_src>
import functools

import jax
import jax.numpy as jnp
from jax import lax
from jax.experimental import pallas as pl
from jax.experimental.pallas import tpu as pltpu


def _round_up(x, m):
    return (x + m - 1) // m * m


def lm_rnn_kernel(emb_ref, w_ih_ref, w_hh_ref, b_h_ref, w_out_ref, b_out_ref,
                  out_ref, h_state, hbuf, *, chunk_t, batch, unroll):
    # emb_ref:   (Tc*Bp, Ep)  bf16, time-major rows of the current chunk
    # w_ih_ref:  (Ep, Hp)     bf16   (resident)
    # w_hh_ref:  (Hp, Hp)     bf16   (resident)
    # b_h_ref:   (1, Hp)      f32    (b_ih + b_hh, zero-padded)
    # w_out_ref: (Hp, Vp)     bf16   (resident)
    # b_out_ref: (1, Vp)      f32
    # out_ref:   (Tc*Bp, Vp)  f32 logits for this chunk
    # h_state:   (Bp, Hp)     f32 recurrent state, persists across grid steps
    # hbuf:      (Tc*Bp, Hp)  f32 scratch: x@W_ih + b (read-only inside the loop)

    @pl.when(pl.program_id(0) == 0)
    def _init():
        h_state[...] = jnp.zeros_like(h_state)

    # (1) Hoisted input projection for the whole chunk (one big MXU matmul, bias folded).
    hbuf[...] = (jnp.dot(emb_ref[...], w_ih_ref[...],
                         preferred_element_type=jnp.float32)
                 + b_h_ref[...])

    # Hoist resident weight loads / bias broadcast out of the loop.
    w_hh = w_hh_ref[...]
    w_out = w_out_ref[...]
    b_out = jnp.broadcast_to(b_out_ref[...], (batch, b_out_ref.shape[1]))

    # (2) Serial recurrence with the output projection interleaved per step.
    #     The (Bp,Hp)x(Hp,Hp)+tanh chain is the only true serial dependency;
    #     the (Bp,Hp)x(Hp,Vp) logits matmul + store are off that path, so the
    #     scheduler overlaps them with later steps' recurrence latency.
    def step(t, h):
        r = pl.multiple_of(t * batch, batch)
        pre = hbuf[pl.ds(r, batch), :] + jnp.dot(
            h.astype(w_hh.dtype), w_hh, preferred_element_type=jnp.float32)
        h_new = jnp.tanh(pre)
        out_ref[pl.ds(r, batch), :] = (
            jnp.dot(h_new.astype(w_out.dtype), w_out,
                    preferred_element_type=jnp.float32) + b_out
        ).astype(out_ref.dtype)
        return h_new

    h_final = lax.fori_loop(0, chunk_t, step, h_state[...], unroll=unroll)
    h_state[...] = h_final  # store recurrent state only at the chunk boundary


def lm_rnn_forward(input_sequence, params, *, target_rows=1024):
    """input_sequence: (B, T) int32 token ids. Returns (B, V, T) float32 logits."""
    emb_table = params["emb_table"]      # (V, Ep) bf16 (pad row zero, padded cols zero)
    w_ih_t = params["w_ih_t"]            # (Ep, Hp) bf16
    w_hh_t = params["w_hh_t"]            # (Hp, Hp) bf16
    b_h = params["b_h"]                  # (1, Hp) f32
    w_out_t = params["w_out_t"]          # (Hp, Vp) bf16
    b_out = params["b_out"]              # (1, Vp) f32
    V = params["output_size"]

    B, T = input_sequence.shape
    Ep, Hp = w_ih_t.shape
    Vp = w_out_t.shape[1]

    # Pad batch to a sublane multiple; pick a time-chunk size targeting ~target_rows
    # MXU rows per chunk.
    Bp = _round_up(B, 8)
    Tc = max(1, min(T, target_rows // Bp))
    Tp = _round_up(T, Tc)
    n_chunks = Tp // Tc
    rows = Tc * Bp

    # Full unroll for short chunks; otherwise the largest power-of-two divisor <= 16.
    if Tc <= 16:
        unroll = Tc
    else:
        unroll = 1
        for d in (16, 8, 4, 2):
            if Tc % d == 0:
                unroll = d
                break

    # Time-major embedding gather in bf16 (table already bf16 + padded, no per-call recast).
    tok = jnp.zeros((Bp, Tp), dtype=input_sequence.dtype)
    tok = tok.at[:B, :T].set(input_sequence)
    tok_tm = tok.T                                   # (Tp, Bp)
    emb_tm = jnp.take(emb_table, tok_tm, axis=0)     # (Tp, Bp, Ep)
    emb_flat = emb_tm.reshape(Tp * Bp, Ep)           # time-major rows

    # VMEM budget: double-buffered emb/out chunks, double-buffered resident weights
    # (the auto-pipeline double-buffers even constant-index blocks), scratch.
    vmem_est = int(
        2 * rows * Ep * 2                        # emb chunk (bf16) x2 buffers
        + 2 * rows * Vp * 4                      # out chunk (f32) x2 buffers
        + 2 * (Ep * Hp + Hp * Hp + Hp * Vp) * 2  # weights (bf16) x2 buffers
        + 2 * (Hp + Vp) * 4                      # biases (f32) x2 buffers
        + Bp * Hp * 4 + rows * Hp * 4            # scratch (h_state, hbuf)
    )
    try:
        vmem_cap = int(pltpu.get_tpu_info().vmem_capacity_bytes)
    except Exception:
        vmem_cap = 64 * 1024 * 1024              # conservative (v7x per-TC size)
    vmem_limit = int(min(max(2 * vmem_est, 32 * 1024 * 1024), (vmem_cap * 3) // 4))

    kernel = functools.partial(lm_rnn_kernel, chunk_t=Tc, batch=Bp, unroll=unroll)

    out_flat = pl.pallas_call(
        kernel,
        out_shape=jax.ShapeDtypeStruct((Tp * Bp, Vp), jnp.float32),
        grid_spec=pltpu.PrefetchScalarGridSpec(
            num_scalar_prefetch=0,
            grid=(n_chunks,),
            in_specs=[
                pl.BlockSpec((rows, Ep), lambda i: (i, 0)),   # emb chunk
                pl.BlockSpec((Ep, Hp), lambda i: (0, 0)),     # W_ih^T (resident)
                pl.BlockSpec((Hp, Hp), lambda i: (0, 0)),     # W_hh^T (resident)
                pl.BlockSpec((1, Hp), lambda i: (0, 0)),      # b_ih + b_hh
                pl.BlockSpec((Hp, Vp), lambda i: (0, 0)),     # W_out^T (resident)
                pl.BlockSpec((1, Vp), lambda i: (0, 0)),      # b_out
            ],
            out_specs=pl.BlockSpec((rows, Vp), lambda i: (i, 0)),
            scratch_shapes=[
                pltpu.VMEM((Bp, Hp), jnp.float32),     # recurrent state across chunks
                pltpu.VMEM((rows, Hp), jnp.float32),   # x@W_ih + b for the chunk
            ],
        ),
        compiler_params=pltpu.CompilerParams(
            dimension_semantics=("arbitrary",),        # sequential over time chunks
            vmem_limit_bytes=vmem_limit,
        ),
    )(emb_flat, w_ih_t, w_hh_t, b_h, w_out_t, b_out)

    logits_tm = out_flat.reshape(Tp, Bp, Vp)[:T, :B, :V]   # (T, B, V)
    # (T, B, V) -> (B, V, T), matching PyTorch's `.permute(0, 2, 1)` of (B, T, V).
    return jnp.transpose(logits_tm, (1, 2, 0))


def init_params(key, emb_size, hidden_size, output_size, pad_index=0):
    k_emb, k_ih, k_hh, k_bih, k_bhh, k_w, k_b = jax.random.split(key, 7)
    bound = 1.0 / jnp.sqrt(hidden_size)

    Ep = _round_up(emb_size, 128)
    Hp = _round_up(hidden_size, 128)
    Vp = _round_up(output_size, 128)

    emb_table = jax.random.normal(k_emb, (output_size, emb_size), jnp.float32)
    emb_table = emb_table.at[pad_index].set(0.0)  # padding_idx row is zero

    w_ih = jax.random.uniform(k_ih, (hidden_size, emb_size), jnp.float32, -bound, bound)
    w_hh = jax.random.uniform(k_hh, (hidden_size, hidden_size), jnp.float32, -bound, bound)
    b_ih = jax.random.uniform(k_bih, (hidden_size,), jnp.float32, -bound, bound)
    b_hh = jax.random.uniform(k_bhh, (hidden_size,), jnp.float32, -bound, bound)
    w_out = jax.random.uniform(k_w, (output_size, hidden_size), jnp.float32, -bound, bound)
    b_out = jax.random.uniform(k_b, (output_size,), jnp.float32, -bound, bound)

    # Zero-pad E/H/V up to lane multiples (padded lanes stay exactly zero through
    # the recurrence since the corresponding weight/bias entries are zero) and
    # pre-cast MXU operands to bf16 once here.
    def pad2(x, r, c):
        return jnp.zeros((r, c), x.dtype).at[:x.shape[0], :x.shape[1]].set(x)

    emb_table_p = pad2(emb_table, output_size, Ep).astype(jnp.bfloat16)   # (V, Ep)
    w_ih_t = pad2(w_ih.T, Ep, Hp).astype(jnp.bfloat16)                    # (Ep, Hp)
    w_hh_t = pad2(w_hh.T, Hp, Hp).astype(jnp.bfloat16)                    # (Hp, Hp)
    w_out_t = pad2(w_out.T, Hp, Vp).astype(jnp.bfloat16)                  # (Hp, Vp)
    b_h = jnp.zeros((1, Hp), jnp.float32).at[0, :hidden_size].set(b_ih + b_hh)
    b_out_p = jnp.zeros((1, Vp), jnp.float32).at[0, :output_size].set(b_out)

    return {
        "emb_table": emb_table_p,   # (V, Ep) bf16
        "w_ih_t": w_ih_t,           # (Ep, Hp) bf16
        "w_hh_t": w_hh_t,           # (Hp, Hp) bf16
        "b_h": b_h,                 # (1, Hp) f32
        "w_out_t": w_out_t,         # (Hp, Vp) bf16
        "b_out": b_out_p,           # (1, Vp) f32
        "output_size": output_size,
        "hidden_size": hidden_size,
    }


def lm_rnn_reference(input_sequence, params):
    """Pure-JAX reference mirroring the kernel's bf16-operand / f32-accumulate matmuls."""
    V = params["output_size"]
    emb = jnp.take(params["emb_table"], input_sequence, axis=0)          # (B,T,Ep) bf16
    B, T, Ep = emb.shape
    Hp = params["w_hh_t"].shape[0]
    w_ih, w_hh, w_out = params["w_ih_t"], params["w_hh_t"], params["w_out_t"]
    b_h, b_out = params["b_h"], params["b_out"]

    def step(h, x_t):
        pre = (jnp.dot(x_t, w_ih, preferred_element_type=jnp.float32)
               + jnp.dot(h.astype(jnp.bfloat16), w_hh, preferred_element_type=jnp.float32)
               + b_h)
        h_new = jnp.tanh(pre)
        return h_new, h_new

    h0 = jnp.zeros((B, Hp), jnp.float32)
    _, hs = lax.scan(step, h0, jnp.transpose(emb, (1, 0, 2)))            # (T, B, Hp) f32
    logits = (jnp.dot(hs.astype(jnp.bfloat16), w_out,
                      preferred_element_type=jnp.float32) + b_out)       # (T, B, Vp)
    return jnp.transpose(logits[:, :, :V], (1, 2, 0))                    # (B, V, T)


if __name__ == "__main__":
    B, T = 2, 16
    emb_size, hidden_size, output_size = 64, 64, 256
    pad_index = 0

    key = jax.random.PRNGKey(0)
    k_params, k_tokens = jax.random.split(key)
    params = init_params(k_params, emb_size, hidden_size, output_size, pad_index)

    input_sequence = jax.random.randint(k_tokens, (B, T), 0, output_size, jnp.int32)

    out = lm_rnn_forward(input_sequence, params)
    out = jax.block_until_ready(out)

    ref = lm_rnn_reference(input_sequence, params)
    assert out.shape == (B, output_size, T)
    assert jnp.allclose(out, ref, atol=5e-3, rtol=5e-3), float(jnp.max(jnp.abs(out - ref)))

    print("KERNEL_OK")
</pallas_src>

<mosaic_0001>
module attributes {stable_mosaic.version = 11 : i64} {
  func.func @lm_rnn_kernel(%arg0: i32, %arg1: memref<128x128xbf16, #tpu.memory_space<vmem>>, %arg2: memref<128x128xbf16, #tpu.memory_space<vmem>>, %arg3: memref<128x128xbf16, #tpu.memory_space<vmem>>, %arg4: memref<1x128xf32, #tpu.memory_space<vmem>>, %arg5: memref<128x256xbf16, #tpu.memory_space<vmem>>, %arg6: memref<1x256xf32, #tpu.memory_space<vmem>>, %arg7: memref<128x256xf32, #tpu.memory_space<vmem>>, %arg8: memref<8x128xf32, #tpu.memory_space<vmem>>, %arg9: memref<128x128xf32, #tpu.memory_space<vmem>>) attributes {dimension_semantics = [#tpu.dimension_semantics<arbitrary>], iteration_bounds = array<i64: 1>, scalar_prefetch = 0 : i64, scratch_operands = 2 : i64, tpu.core_type = #tpu.core_type<tc>, window_params = [{transform_indices = @transform_0, window_bounds = array<i64: 128, 128>}, {pipeline_mode = #tpu.pipeline_mode<synchronous>, transform_indices = @transform_1, window_bounds = array<i64: 128, 128>}, {pipeline_mode = #tpu.pipeline_mode<synchronous>, transform_indices = @transform_2, window_bounds = array<i64: 128, 128>}, {pipeline_mode = #tpu.pipeline_mode<synchronous>, transform_indices = @transform_3, window_bounds = array<i64: 1, 128>}, {pipeline_mode = #tpu.pipeline_mode<synchronous>, transform_indices = @transform_4, window_bounds = array<i64: 128, 256>}, {pipeline_mode = #tpu.pipeline_mode<synchronous>, transform_indices = @transform_5, window_bounds = array<i64: 1, 256>}, {transform_indices = @transform_6, window_bounds = array<i64: 128, 256>}]} {
    %c0_i32 = arith.constant 0 : i32
    %0 = arith.cmpi eq, %arg0, %c0_i32 : i32
    %1 = arith.extui %0 : i1 to i32
    %c0_i32_0 = arith.constant 0 : i32
    %2 = arith.cmpi ne, %1, %c0_i32_0 : i32
    scf.if %2 {
      %cst_99 = arith.constant 0.000000e+00 : f32
      %225 = vector.broadcast %cst_99 : f32 to vector<8x128xf32>
      %c0_100 = arith.constant 0 : index
      %c0_101 = arith.constant 0 : index
      %226 = vector.load %arg8[%c0_100, %c0_101] : memref<8x128xf32, #tpu.memory_space<vmem>>, vector<8x128xf32>
      tpu.vector_store %arg8[%c0_100, %c0_101], %225 {strides = array<i32>} : memref<8x128xf32, #tpu.memory_space<vmem>>, vector<8x128xf32>,
    } else {
    }
    %c0 = arith.constant 0 : index
    %c0_1 = arith.constant 0 : index
    %3 = vector.load %arg1[%c0, %c0_1] : memref<128x128xbf16, #tpu.memory_space<vmem>>, vector<128x128xbf16>
    %c0_2 = arith.constant 0 : index
    %c0_3 = arith.constant 0 : index
    %4 = vector.load %arg2[%c0_2, %c0_3] : memref<128x128xbf16, #tpu.memory_space<vmem>>, vector<128x128xbf16>
    %cst = arith.constant dense<0.000000e+00> : vector<128x128xf32>
    %5 = tpu.matmul %3, %4, %cst {dimension_numbers = #tpu.dot_dimension_numbers<[1], [0], [0], [1], [0, 0, 1, 1], [], []>} : vector<128x128xbf16>, vector<128x128xbf16>, vector<128x128xf32> -> vector<128x128xf32>
    %c0_4 = arith.constant 0 : index
    %c0_5 = arith.constant 0 : index
    %6 = vector.load %arg4[%c0_4, %c0_5] : memref<1x128xf32, #tpu.memory_space<vmem>>, vector<1x128xf32>
    %7 = vector.broadcast %6 : vector<1x128xf32> to vector<128x128xf32>
    %8 = arith.addf %5, %7 : vector<128x128xf32>
    %c0_6 = arith.constant 0 : index
    %c0_7 = arith.constant 0 : index
    %9 = vector.load %arg9[%c0_6, %c0_7] : memref<128x128xf32, #tpu.memory_space<vmem>>, vector<128x128xf32>
    tpu.vector_store %arg9[%c0_6, %c0_7], %8 {strides = array<i32>} : memref<128x128xf32, #tpu.memory_space<vmem>>, vector<128x128xf32>,
    %c0_8 = arith.constant 0 : index
    %c0_9 = arith.constant 0 : index
    %10 = vector.load %arg3[%c0_8, %c0_9] : memref<128x128xbf16, #tpu.memory_space<vmem>>, vector<128x128xbf16>
    %c0_10 = arith.constant 0 : index
    %c0_11 = arith.constant 0 : index
    %11 = vector.load %arg5[%c0_10, %c0_11] : memref<128x256xbf16, #tpu.memory_space<vmem>>, vector<128x256xbf16>
    %c0_12 = arith.constant 0 : index
    %c0_13 = arith.constant 0 : index
    %12 = vector.load %arg6[%c0_12, %c0_13] : memref<1x256xf32, #tpu.memory_space<vmem>>, vector<1x256xf32>
    %13 = vector.shape_cast %12 : vector<1x256xf32> to vector<1x256xf32>
    %14 = vector.broadcast %13 : vector<1x256xf32> to vector<8x256xf32>
    %c0_14 = arith.constant 0 : index
    %c0_15 = arith.constant 0 : index
    %15 = vector.load %arg8[%c0_14, %c0_15] : memref<8x128xf32, #tpu.memory_space<vmem>>, vector<8x128xf32>
    %c0_i32_16 = arith.constant 0 : i32
    %c8_i32 = arith.constant 8 : i32
    %16 = arith.muli %c0_i32_16, %c8_i32 : i32
    %17 = tpu.assume_multiple %16, 8 : i32
    %18 = arith.index_cast %17 : i32 to index
    %c0_17 = arith.constant 0 : index
    %19 = vector.load %arg9[%18, %c0_17] : memref<128x128xf32, #tpu.memory_space<vmem>>, vector<8x128xf32>
    %20 = arith.truncf %15 : vector<8x128xf32> to vector<8x128xbf16>
    %cst_18 = arith.constant dense<0.000000e+00> : vector<8x128xf32>
    %21 = tpu.matmul %20, %10, %cst_18 {dimension_numbers = #tpu.dot_dimension_numbers<[1], [0], [0], [1], [0, 0, 1, 1], [], []>} : vector<8x128xbf16>, vector<128x128xbf16>, vector<8x128xf32> -> vector<8x128xf32>
    %22 = arith.addf %19, %21 : vector<8x128xf32>
    %23 = math.tanh %22 : vector<8x128xf32>
    %24 = arith.truncf %23 : vector<8x128xf32> to vector<8x128xbf16>
    %cst_19 = arith.constant dense<0.000000e+00> : vector<8x256xf32>
    %25 = tpu.matmul %24, %11, %cst_19 {dimension_numbers = #tpu.dot_dimension_numbers<[1], [0], [0], [1], [0, 0, 1, 1], [], []>} : vector<8x128xbf16>, vector<128x256xbf16>, vector<8x256xf32> -> vector<8x256xf32>
    %26 = arith.addf %25, %14 : vector<8x256xf32>
    %27 = arith.index_cast %17 : i32 to index
    %c0_20 = arith.constant 0 : index
    %28 = vector.load %arg7[%27, %c0_20] : memref<128x256xf32, #tpu.memory_space<vmem>>, vector<8x256xf32>
    tpu.vector_store %arg7[%27, %c0_20], %26 {strides = array<i32>} : memref<128x256xf32, #tpu.memory_space<vmem>>, vector<8x256xf32>,
    %c1_i32 = arith.constant 1 : i32
    %c8_i32_21 = arith.constant 8 : i32
    %29 = arith.muli %c1_i32, %c8_i32_21 : i32
    %30 = tpu.assume_multiple %29, 8 : i32
    %31 = arith.index_cast %30 : i32 to index
    %c0_22 = arith.constant 0 : index
    %32 = vector.load %arg9[%31, %c0_22] : memref<128x128xf32, #tpu.memory_space<vmem>>, vector<8x128xf32>
    %33 = arith.truncf %23 : vector<8x128xf32> to vector<8x128xbf16>
    %cst_23 = arith.constant dense<0.000000e+00> : vector<8x128xf32>
    %34 = tpu.matmul %33, %10, %cst_23 {dimension_numbers = #tpu.dot_dimension_numbers<[1], [0], [0], [1], [0, 0, 1, 1], [], []>} : vector<8x128xbf16>, vector<128x128xbf16>, vector<8x128xf32> -> vector<8x128xf32>
    %35 = arith.addf %32, %34 : vector<8x128xf32>
    %36 = math.tanh %35 : vector<8x128xf32>
    %37 = arith.truncf %36 : vector<8x128xf32> to vector<8x128xbf16>
    %cst_24 = arith.constant dense<0.000000e+00> : vector<8x256xf32>
    %38 = tpu.matmul %37, %11, %cst_24 {dimension_numbers = #tpu.dot_dimension_numbers<[1], [0], [0], [1], [0, 0, 1, 1], [], []>} : vector<8x128xbf16>, vector<128x256xbf16>, vector<8x256xf32> -> vector<8x256xf32>
    %39 = arith.addf %38, %14 : vector<8x256xf32>
    %40 = arith.index_cast %30 : i32 to index
    %c0_25 = arith.constant 0 : index
    %41 = vector.load %arg7[%40, %c0_25] : memref<128x256xf32, #tpu.memory_space<vmem>>, vector<8x256xf32>
    tpu.vector_store %arg7[%40, %c0_25], %39 {strides = array<i32>} : memref<128x256xf32, #tpu.memory_space<vmem>>, vector<8x256xf32>,
    %c2_i32 = arith.constant 2 : i32
    %c8_i32_26 = arith.constant 8 : i32
    %42 = arith.muli %c2_i32, %c8_i32_26 : i32
    %43 = tpu.assume_multiple %42, 8 : i32
    %44 = arith.index_cast %43 : i32 to index
    %c0_27 = arith.constant 0 : index
    %45 = vector.load %arg9[%44, %c0_27] : memref<128x128xf32, #tpu.memory_space<vmem>>, vector<8x128xf32>
    %46 = arith.truncf %36 : vector<8x128xf32> to vector<8x128xbf16>
    %cst_28 = arith.constant dense<0.000000e+00> : vector<8x128xf32>
    %47 = tpu.matmul %46, %10, %cst_28 {dimension_numbers = #tpu.dot_dimension_numbers<[1], [0], [0], [1], [0, 0, 1, 1], [], []>} : vector<8x128xbf16>, vector<128x128xbf16>, vector<8x128xf32> -> vector<8x128xf32>
    %48 = arith.addf %45, %47 : vector<8x128xf32>
    %49 = math.tanh %48 : vector<8x128xf32>
    %50 = arith.truncf %49 : vector<8x128xf32> to vector<8x128xbf16>
    %cst_29 = arith.constant dense<0.000000e+00> : vector<8x256xf32>
    %51 = tpu.matmul %50, %11, %cst_29 {dimension_numbers = #tpu.dot_dimension_numbers<[1], [0], [0], [1], [0, 0, 1, 1], [], []>} : vector<8x128xbf16>, vector<128x256xbf16>, vector<8x256xf32> -> vector<8x256xf32>
    %52 = arith.addf %51, %14 : vector<8x256xf32>
    %53 = arith.index_cast %43 : i32 to index
    %c0_30 = arith.constant 0 : index
    %54 = vector.load %arg7[%53, %c0_30] : memref<128x256xf32, #tpu.memory_space<vmem>>, vector<8x256xf32>
    tpu.vector_store %arg7[%53, %c0_30], %52 {strides = array<i32>} : memref<128x256xf32, #tpu.memory_space<vmem>>, vector<8x256xf32>,
    %c3_i32 = arith.constant 3 : i32
    %c8_i32_31 = arith.constant 8 : i32
    %55 = arith.muli %c3_i32, %c8_i32_31 : i32
    %56 = tpu.assume_multiple %55, 8 : i32
    %57 = arith.index_cast %56 : i32 to index
    %c0_32 = arith.constant 0 : index
    %58 = vector.load %arg9[%57, %c0_32] : memref<128x128xf32, #tpu.memory_space<vmem>>, vector<8x128xf32>
    %59 = arith.truncf %49 : vector<8x128xf32> to vector<8x128xbf16>
    %cst_33 = arith.constant dense<0.000000e+00> : vector<8x128xf32>
    %60 = tpu.matmul %59, %10, %cst_33 {dimension_numbers = #tpu.dot_dimension_numbers<[1], [0], [0], [1], [0, 0, 1, 1], [], []>} : vector<8x128xbf16>, vector<128x128xbf16>, vector<8x128xf32> -> vector<8x128xf32>
    %61 = arith.addf %58, %60 : vector<8x128xf32>
    %62 = math.tanh %61 : vector<8x128xf32>
    %63 = arith.truncf %62 : vector<8x128xf32> to vector<8x128xbf16>
    %cst_34 = arith.constant dense<0.000000e+00> : vector<8x256xf32>
    %64 = tpu.matmul %63, %11, %cst_34 {dimension_numbers = #tpu.dot_dimension_numbers<[1], [0], [0], [1], [0, 0, 1, 1], [], []>} : vector<8x128xbf16>, vector<128x256xbf16>, vector<8x256xf32> -> vector<8x256xf32>
    %65 = arith.addf %64, %14 : vector<8x256xf32>
    %66 = arith.index_cast %56 : i32 to index
    %c0_35 = arith.constant 0 : index
    %67 = vector.load %arg7[%66, %c0_35] : memref<128x256xf32, #tpu.memory_space<vmem>>, vector<8x256xf32>
    tpu.vector_store %arg7[%66, %c0_35], %65 {strides = array<i32>} : memref<128x256xf32, #tpu.memory_space<vmem>>, vector<8x256xf32>,
    %c4_i32 = arith.constant 4 : i32
    %c8_i32_36 = arith.constant 8 : i32
    %68 = arith.muli %c4_i32, %c8_i32_36 : i32
    %69 = tpu.assume_multiple %68, 8 : i32
    %70 = arith.index_cast %69 : i32 to index
    %c0_37 = arith.constant 0 : index
    %71 = vector.load %arg9[%70, %c0_37] : memref<128x128xf32, #tpu.memory_space<vmem>>, vector<8x128xf32>
    %72 = arith.truncf %62 : vector<8x128xf32> to vector<8x128xbf16>
    %cst_38 = arith.constant dense<0.000000e+00> : vector<8x128xf32>
    %73 = tpu.matmul %72, %10, %cst_38 {dimension_numbers = #tpu.dot_dimension_numbers<[1], [0], [0], [1], [0, 0, 1, 1], [], []>} : vector<8x128xbf16>, vector<128x128xbf16>, vector<8x128xf32> -> vector<8x128xf32>
    %74 = arith.addf %71, %73 : vector<8x128xf32>
    %75 = math.tanh %74 : vector<8x128xf32>
    %76 = arith.truncf %75 : vector<8x128xf32> to vector<8x128xbf16>
    %cst_39 = arith.constant dense<0.000000e+00> : vector<8x256xf32>
    %77 = tpu.matmul %76, %11, %cst_39 {dimension_numbers = #tpu.dot_dimension_numbers<[1], [0], [0], [1], [0, 0, 1, 1], [], []>} : vector<8x128xbf16>, vector<128x256xbf16>, vector<8x256xf32> -> vector<8x256xf32>
    %78 = arith.addf %77, %14 : vector<8x256xf32>
    %79 = arith.index_cast %69 : i32 to index
    %c0_40 = arith.constant 0 : index
    %80 = vector.load %arg7[%79, %c0_40] : memref<128x256xf32, #tpu.memory_space<vmem>>, vector<8x256xf32>
    tpu.vector_store %arg7[%79, %c0_40], %78 {strides = array<i32>} : memref<128x256xf32, #tpu.memory_space<vmem>>, vector<8x256xf32>,
    %c5_i32 = arith.constant 5 : i32
    %c8_i32_41 = arith.constant 8 : i32
    %81 = arith.muli %c5_i32, %c8_i32_41 : i32
    %82 = tpu.assume_multiple %81, 8 : i32
    %83 = arith.index_cast %82 : i32 to index
    %c0_42 = arith.constant 0 : index
    %84 = vector.load %arg9[%83, %c0_42] : memref<128x128xf32, #tpu.memory_space<vmem>>, vector<8x128xf32>
    %85 = arith.truncf %75 : vector<8x128xf32> to vector<8x128xbf16>
    %cst_43 = arith.constant dense<0.000000e+00> : vector<8x128xf32>
    %86 = tpu.matmul %85, %10, %cst_43 {dimension_numbers = #tpu.dot_dimension_numbers<[1], [0], [0], [1], [0, 0, 1, 1], [], []>} : vector<8x128xbf16>, vector<128x128xbf16>, vector<8x128xf32> -> vector<8x128xf32>
    %87 = arith.addf %84, %86 : vector<8x128xf32>
    %88 = math.tanh %87 : vector<8x128xf32>
    %89 = arith.truncf %88 : vector<8x128xf32> to vector<8x128xbf16>
    %cst_44 = arith.constant dense<0.000000e+00> : vector<8x256xf32>
    %90 = tpu.matmul %89, %11, %cst_44 {dimension_numbers = #tpu.dot_dimension_numbers<[1], [0], [0], [1], [0, 0, 1, 1], [], []>} : vector<8x128xbf16>, vector<128x256xbf16>, vector<8x256xf32> -> vector<8x256xf32>
    %91 = arith.addf %90, %14 : vector<8x256xf32>
    %92 = arith.index_cast %82 : i32 to index
    %c0_45 = arith.constant 0 : index
    %93 = vector.load %arg7[%92, %c0_45] : memref<128x256xf32, #tpu.memory_space<vmem>>, vector<8x256xf32>
    tpu.vector_store %arg7[%92, %c0_45], %91 {strides = array<i32>} : memref<128x256xf32, #tpu.memory_space<vmem>>, vector<8x256xf32>,
    %c6_i32 = arith.constant 6 : i32
    %c8_i32_46 = arith.constant 8 : i32
    %94 = arith.muli %c6_i32, %c8_i32_46 : i32
    %95 = tpu.assume_multiple %94, 8 : i32
    %96 = arith.index_cast %95 : i32 to index
    %c0_47 = arith.constant 0 : index
    %97 = vector.load %arg9[%96, %c0_47] : memref<128x128xf32, #tpu.memory_space<vmem>>, vector<8x128xf32>
    %98 = arith.truncf %88 : vector<8x128xf32> to vector<8x128xbf16>
    %cst_48 = arith.constant dense<0.000000e+00> : vector<8x128xf32>
    %99 = tpu.matmul %98, %10, %cst_48 {dimension_numbers = #tpu.dot_dimension_numbers<[1], [0], [0], [1], [0, 0, 1, 1], [], []>} : vector<8x128xbf16>, vector<128x128xbf16>, vector<8x128xf32> -> vector<8x128xf32>
    %100 = arith.addf %97, %99 : vector<8x128xf32>
    %101 = math.tanh %100 : vector<8x128xf32>
    %102 = arith.truncf %101 : vector<8x128xf32> to vector<8x128xbf16>
    %cst_49 = arith.constant dense<0.000000e+00> : vector<8x256xf32>
    %103 = tpu.matmul %102, %11, %cst_49 {dimension_numbers = #tpu.dot_dimension_numbers<[1], [0], [0], [1], [0, 0, 1, 1], [], []>} : vector<8x128xbf16>, vector<128x256xbf16>, vector<8x256xf32> -> vector<8x256xf32>
    %104 = arith.addf %103, %14 : vector<8x256xf32>
    %105 = arith.index_cast %95 : i32 to index
    %c0_50 = arith.constant 0 : index
    %106 = vector.load %arg7[%105, %c0_50] : memref<128x256xf32, #tpu.memory_space<vmem>>, vector<8x256xf32>
    tpu.vector_store %arg7[%105, %c0_50], %104 {strides = array<i32>} : memref<128x256xf32, #tpu.memory_space<vmem>>, vector<8x256xf32>,
    %c7_i32 = arith.constant 7 : i32
    %c8_i32_51 = arith.constant 8 : i32
    %107 = arith.muli %c7_i32, %c8_i32_51 : i32
    %108 = tpu.assume_multiple %107, 8 : i32
    %109 = arith.index_cast %108 : i32 to index
    %c0_52 = arith.constant 0 : index
    %110 = vector.load %arg9[%109, %c0_52] : memref<128x128xf32, #tpu.memory_space<vmem>>, vector<8x128xf32>
    %111 = arith.truncf %101 : vector<8x128xf32> to vector<8x128xbf16>
    %cst_53 = arith.constant dense<0.000000e+00> : vector<8x128xf32>
    %112 = tpu.matmul %111, %10, %cst_53 {dimension_numbers = #tpu.dot_dimension_numbers<[1], [0], [0], [1], [0, 0, 1, 1], [], []>} : vector<8x128xbf16>, vector<128x128xbf16>, vector<8x128xf32> -> vector<8x128xf32>
    %113 = arith.addf %110, %112 : vector<8x128xf32>
    %114 = math.tanh %113 : vector<8x128xf32>
    %115 = arith.truncf %114 : vector<8x128xf32> to vector<8x128xbf16>
    %cst_54 = arith.constant dense<0.000000e+00> : vector<8x256xf32>
    %116 = tpu.matmul %115, %11, %cst_54 {dimension_numbers = #tpu.dot_dimension_numbers<[1], [0], [0], [1], [0, 0, 1, 1], [], []>} : vector<8x128xbf16>, vector<128x256xbf16>, vector<8x256xf32> -> vector<8x256xf32>
    %117 = arith.addf %116, %14 : vector<8x256xf32>
    %118 = arith.index_cast %108 : i32 to index
    %c0_55 = arith.constant 0 : index
    %119 = vector.load %arg7[%118, %c0_55] : memref<128x256xf32, #tpu.memory_space<vmem>>, vector<8x256xf32>
    tpu.vector_store %arg7[%118, %c0_55], %117 {strides = array<i32>} : memref<128x256xf32, #tpu.memory_space<vmem>>, vector<8x256xf32>,
    %c8_i32_56 = arith.constant 8 : i32
    %c8_i32_57 = arith.constant 8 : i32
    %120 = arith.muli %c8_i32_56, %c8_i32_57 : i32
    %121 = tpu.assume_multiple %120, 8 : i32
    %122 = arith.index_cast %121 : i32 to index
    %c0_58 = arith.constant 0 : index
    %123 = vector.load %arg9[%122, %c0_58] : memref<128x128xf32, #tpu.memory_space<vmem>>, vector<8x128xf32>
    %124 = arith.truncf %114 : vector<8x128xf32> to vector<8x128xbf16>
    %cst_59 = arith.constant dense<0.000000e+00> : vector<8x128xf32>
    %125 = tpu.matmul %124, %10, %cst_59 {dimension_numbers = #tpu.dot_dimension_numbers<[1], [0], [0], [1], [0, 0, 1, 1], [], []>} : vector<8x128xbf16>, vector<128x128xbf16>, vector<8x128xf32> -> vector<8x128xf32>
    %126 = arith.addf %123, %125 : vector<8x128xf32>
    %127 = math.tanh %126 : vector<8x128xf32>
    %128 = arith.truncf %127 : vector<8x128xf32> to vector<8x128xbf16>
    %cst_60 = arith.constant dense<0.000000e+00> : vector<8x256xf32>
    %129 = tpu.matmul %128, %11, %cst_60 {dimension_numbers = #tpu.dot_dimension_numbers<[1], [0], [0], [1], [0, 0, 1, 1], [], []>} : vector<8x128xbf16>, vector<128x256xbf16>, vector<8x256xf32> -> vector<8x256xf32>
    %130 = arith.addf %129, %14 : vector<8x256xf32>
    %131 = arith.index_cast %121 : i32 to index
    %c0_61 = arith.constant 0 : index
    %132 = vector.load %arg7[%131, %c0_61] : memref<128x256xf32, #tpu.memory_space<vmem>>, vector<8x256xf32>
    tpu.vector_store %arg7[%131, %c0_61], %130 {strides = array<i32>} : memref<128x256xf32, #tpu.memory_space<vmem>>, vector<8x256xf32>,
    %c9_i32 = arith.constant 9 : i32
    %c8_i32_62 = arith.constant 8 : i32
    %133 = arith.muli %c9_i32, %c8_i32_62 : i32
    %134 = tpu.assume_multiple %133, 8 : i32
    %135 = arith.index_cast %134 : i32 to index
    %c0_63 = arith.constant 0 : index
    %136 = vector.load %arg9[%135, %c0_63] : memref<128x128xf32, #tpu.memory_space<vmem>>, vector<8x128xf32>
    %137 = arith.truncf %127 : vector<8x128xf32> to vector<8x128xbf16>
    %cst_64 = arith.constant dense<0.000000e+00> : vector<8x128xf32>
    %138 = tpu.matmul %137, %10, %cst_64 {dimension_numbers = #tpu.dot_dimension_numbers<[1], [0], [0], [1], [0, 0, 1, 1], [], []>} : vector<8x128xbf16>, vector<128x128xbf16>, vector<8x128xf32> -> vector<8x128xf32>
    %139 = arith.addf %136, %138 : vector<8x128xf32>
    %140 = math.tanh %139 : vector<8x128xf32>
    %141 = arith.truncf %140 : vector<8x128xf32> to vector<8x128xbf16>
    %cst_65 = arith.constant dense<0.000000e+00> : vector<8x256xf32>
    %142 = tpu.matmul %141, %11, %cst_65 {dimension_numbers = #tpu.dot_dimension_numbers<[1], [0], [0], [1], [0, 0, 1, 1], [], []>} : vector<8x128xbf16>, vector<128x256xbf16>, vector<8x256xf32> -> vector<8x256xf32>
    %143 = arith.addf %142, %14 : vector<8x256xf32>
    %144 = arith.index_cast %134 : i32 to index
    %c0_66 = arith.constant 0 : index
    %145 = vector.load %arg7[%144, %c0_66] : memref<128x256xf32, #tpu.memory_space<vmem>>, vector<8x256xf32>
    tpu.vector_store %arg7[%144, %c0_66], %143 {strides = array<i32>} : memref<128x256xf32, #tpu.memory_space<vmem>>, vector<8x256xf32>,
    %c10_i32 = arith.constant 10 : i32
    %c8_i32_67 = arith.constant 8 : i32
    %146 = arith.muli %c10_i32, %c8_i32_67 : i32
    %147 = tpu.assume_multiple %146, 8 : i32
    %148 = arith.index_cast %147 : i32 to index
    %c0_68 = arith.constant 0 : index
    %149 = vector.load %arg9[%148, %c0_68] : memref<128x128xf32, #tpu.memory_space<vmem>>, vector<8x128xf32>
    %150 = arith.truncf %140 : vector<8x128xf32> to vector<8x128xbf16>
    %cst_69 = arith.constant dense<0.000000e+00> : vector<8x128xf32>
    %151 = tpu.matmul %150, %10, %cst_69 {dimension_numbers = #tpu.dot_dimension_numbers<[1], [0], [0], [1], [0, 0, 1, 1], [], []>} : vector<8x128xbf16>, vector<128x128xbf16>, vector<8x128xf32> -> vector<8x128xf32>
    %152 = arith.addf %149, %151 : vector<8x128xf32>
    %153 = math.tanh %152 : vector<8x128xf32>
    %154 = arith.truncf %153 : vector<8x128xf32> to vector<8x128xbf16>
    %cst_70 = arith.constant dense<0.000000e+00> : vector<8x256xf32>
    %155 = tpu.matmul %154, %11, %cst_70 {dimension_numbers = #tpu.dot_dimension_numbers<[1], [0], [0], [1], [0, 0, 1, 1], [], []>} : vector<8x128xbf16>, vector<128x256xbf16>, vector<8x256xf32> -> vector<8x256xf32>
    %156 = arith.addf %155, %14 : vector<8x256xf32>
    %157 = arith.index_cast %147 : i32 to index
    %c0_71 = arith.constant 0 : index
    %158 = vector.load %arg7[%157, %c0_71] : memref<128x256xf32, #tpu.memory_space<vmem>>, vector<8x256xf32>
    tpu.vector_store %arg7[%157, %c0_71], %156 {strides = array<i32>} : memref<128x256xf32, #tpu.memory_space<vmem>>, vector<8x256xf32>,
    %c11_i32 = arith.constant 11 : i32
    %c8_i32_72 = arith.constant 8 : i32
    %159 = arith.muli %c11_i32, %c8_i32_72 : i32
    %160 = tpu.assume_multiple %159, 8 : i32
    %161 = arith.index_cast %160 : i32 to index
    %c0_73 = arith.constant 0 : index
    %162 = vector.load %arg9[%161, %c0_73] : memref<128x128xf32, #tpu.memory_space<vmem>>, vector<8x128xf32>
    %163 = arith.truncf %153 : vector<8x128xf32> to vector<8x128xbf16>
    %cst_74 = arith.constant dense<0.000000e+00> : vector<8x128xf32>
    %164 = tpu.matmul %163, %10, %cst_74 {dimension_numbers = #tpu.dot_dimension_numbers<[1], [0], [0], [1], [0, 0, 1, 1], [], []>} : vector<8x128xbf16>, vector<128x128xbf16>, vector<8x128xf32> -> vector<8x128xf32>
    %165 = arith.addf %162, %164 : vector<8x128xf32>
    %166 = math.tanh %165 : vector<8x128xf32>
    %167 = arith.truncf %166 : vector<8x128xf32> to vector<8x128xbf16>
    %cst_75 = arith.constant dense<0.000000e+00> : vector<8x256xf32>
    %168 = tpu.matmul %167, %11, %cst_75 {dimension_numbers = #tpu.dot_dimension_numbers<[1], [0], [0], [1], [0, 0, 1, 1], [], []>} : vector<8x128xbf16>, vector<128x256xbf16>, vector<8x256xf32> -> vector<8x256xf32>
    %169 = arith.addf %168, %14 : vector<8x256xf32>
    %170 = arith.index_cast %160 : i32 to index
    %c0_76 = arith.constant 0 : index
    %171 = vector.load %arg7[%170, %c0_76] : memref<128x256xf32, #tpu.memory_space<vmem>>, vector<8x256xf32>
    tpu.vector_store %arg7[%170, %c0_76], %169 {strides = array<i32>} : memref<128x256xf32, #tpu.memory_space<vmem>>, vector<8x256xf32>,
    %c12_i32 = arith.constant 12 : i32
    %c8_i32_77 = arith.constant 8 : i32
    %172 = arith.muli %c12_i32, %c8_i32_77 : i32
    %173 = tpu.assume_multiple %172, 8 : i32
    %174 = arith.index_cast %173 : i32 to index
    %c0_78 = arith.constant 0 : index
    %175 = vector.load %arg9[%174, %c0_78] : memref<128x128xf32, #tpu.memory_space<vmem>>, vector<8x128xf32>
    %176 = arith.truncf %166 : vector<8x128xf32> to vector<8x128xbf16>
    %cst_79 = arith.constant dense<0.000000e+00> : vector<8x128xf32>
    %177 = tpu.matmul %176, %10, %cst_79 {dimension_numbers = #tpu.dot_dimension_numbers<[1], [0], [0], [1], [0, 0, 1, 1], [], []>} : vector<8x128xbf16>, vector<128x128xbf16>, vector<8x128xf32> -> vector<8x128xf32>
    %178 = arith.addf %175, %177 : vector<8x128xf32>
    %179 = math.tanh %178 : vector<8x128xf32>
    %180 = arith.truncf %179 : vector<8x128xf32> to vector<8x128xbf16>
    %cst_80 = arith.constant dense<0.000000e+00> : vector<8x256xf32>
    %181 = tpu.matmul %180, %11, %cst_80 {dimension_numbers = #tpu.dot_dimension_numbers<[1], [0], [0], [1], [0, 0, 1, 1], [], []>} : vector<8x128xbf16>, vector<128x256xbf16>, vector<8x256xf32> -> vector<8x256xf32>
    %182 = arith.addf %181, %14 : vector<8x256xf32>
    %183 = arith.index_cast %173 : i32 to index
    %c0_81 = arith.constant 0 : index
    %184 = vector.load %arg7[%183, %c0_81] : memref<128x256xf32, #tpu.memory_space<vmem>>, vector<8x256xf32>
    tpu.vector_store %arg7[%183, %c0_81], %182 {strides = array<i32>} : memref<128x256xf32, #tpu.memory_space<vmem>>, vector<8x256xf32>,
    %c13_i32 = arith.constant 13 : i32
    %c8_i32_82 = arith.constant 8 : i32
    %185 = arith.muli %c13_i32, %c8_i32_82 : i32
    %186 = tpu.assume_multiple %185, 8 : i32
    %187 = arith.index_cast %186 : i32 to index
    %c0_83 = arith.constant 0 : index
    %188 = vector.load %arg9[%187, %c0_83] : memref<128x128xf32, #tpu.memory_space<vmem>>, vector<8x128xf32>
    %189 = arith.truncf %179 : vector<8x128xf32> to vector<8x128xbf16>
    %cst_84 = arith.constant dense<0.000000e+00> : vector<8x128xf32>
    %190 = tpu.matmul %189, %10, %cst_84 {dimension_numbers = #tpu.dot_dimension_numbers<[1], [0], [0], [1], [0, 0, 1, 1], [], []>} : vector<8x128xbf16>, vector<128x128xbf16>, vector<8x128xf32> -> vector<8x128xf32>
    %191 = arith.addf %188, %190 : vector<8x128xf32>
    %192 = math.tanh %191 : vector<8x128xf32>
    %193 = arith.truncf %192 : vector<8x128xf32> to vector<8x128xbf16>
    %cst_85 = arith.constant dense<0.000000e+00> : vector<8x256xf32>
    %194 = tpu.matmul %193, %11, %cst_85 {dimension_numbers = #tpu.dot_dimension_numbers<[1], [0], [0], [1], [0, 0, 1, 1], [], []>} : vector<8x128xbf16>, vector<128x256xbf16>, vector<8x256xf32> -> vector<8x256xf32>
    %195 = arith.addf %194, %14 : vector<8x256xf32>
    %196 = arith.index_cast %186 : i32 to index
    %c0_86 = arith.constant 0 : index
    %197 = vector.load %arg7[%196, %c0_86] : memref<128x256xf32, #tpu.memory_space<vmem>>, vector<8x256xf32>
    tpu.vector_store %arg7[%196, %c0_86], %195 {strides = array<i32>} : memref<128x256xf32, #tpu.memory_space<vmem>>, vector<8x256xf32>,
    %c14_i32 = arith.constant 14 : i32
    %c8_i32_87 = arith.constant 8 : i32
    %198 = arith.muli %c14_i32, %c8_i32_87 : i32
    %199 = tpu.assume_multiple %198, 8 : i32
    %200 = arith.index_cast %199 : i32 to index
    %c0_88 = arith.constant 0 : index
    %201 = vector.load %arg9[%200, %c0_88] : memref<128x128xf32, #tpu.memory_space<vmem>>, vector<8x128xf32>
    %202 = arith.truncf %192 : vector<8x128xf32> to vector<8x128xbf16>
    %cst_89 = arith.constant dense<0.000000e+00> : vector<8x128xf32>
    %203 = tpu.matmul %202, %10, %cst_89 {dimension_numbers = #tpu.dot_dimension_numbers<[1], [0], [0], [1], [0, 0, 1, 1], [], []>} : vector<8x128xbf16>, vector<128x128xbf16>, vector<8x128xf32> -> vector<8x128xf32>
    %204 = arith.addf %201, %203 : vector<8x128xf32>
    %205 = math.tanh %204 : vector<8x128xf32>
    %206 = arith.truncf %205 : vector<8x128xf32> to vector<8x128xbf16>
    %cst_90 = arith.constant dense<0.000000e+00> : vector<8x256xf32>
    %207 = tpu.matmul %206, %11, %cst_90 {dimension_numbers = #tpu.dot_dimension_numbers<[1], [0], [0], [1], [0, 0, 1, 1], [], []>} : vector<8x128xbf16>, vector<128x256xbf16>, vector<8x256xf32> -> vector<8x256xf32>
    %208 = arith.addf %207, %14 : vector<8x256xf32>
    %209 = arith.index_cast %199 : i32 to index
    %c0_91 = arith.constant 0 : index
    %210 = vector.load %arg7[%209, %c0_91] : memref<128x256xf32, #tpu.memory_space<vmem>>, vector<8x256xf32>
    tpu.vector_store %arg7[%209, %c0_91], %208 {strides = array<i32>} : memref<128x256xf32, #tpu.memory_space<vmem>>, vector<8x256xf32>,
    %c15_i32 = arith.constant 15 : i32
    %c8_i32_92 = arith.constant 8 : i32
    %211 = arith.muli %c15_i32, %c8_i32_92 : i32
    %212 = tpu.assume_multiple %211, 8 : i32
    %213 = arith.index_cast %212 : i32 to index
    %c0_93 = arith.constant 0 : index
    %214 = vector.load %arg9[%213, %c0_93] : memref<128x128xf32, #tpu.memory_space<vmem>>, vector<8x128xf32>
    %215 = arith.truncf %205 : vector<8x128xf32> to vector<8x128xbf16>
    %cst_94 = arith.constant dense<0.000000e+00> : vector<8x128xf32>
    %216 = tpu.matmul %215, %10, %cst_94 {dimension_numbers = #tpu.dot_dimension_numbers<[1], [0], [0], [1], [0, 0, 1, 1], [], []>} : vector<8x128xbf16>, vector<128x128xbf16>, vector<8x128xf32> -> vector<8x128xf32>
    %217 = arith.addf %214, %216 : vector<8x128xf32>
    %218 = math.tanh %217 : vector<8x128xf32>
    %219 = arith.truncf %218 : vector<8x128xf32> to vector<8x128xbf16>
    %cst_95 = arith.constant dense<0.000000e+00> : vector<8x256xf32>
    %220 = tpu.matmul %219, %11, %cst_95 {dimension_numbers = #tpu.dot_dimension_numbers<[1], [0], [0], [1], [0, 0, 1, 1], [], []>} : vector<8x128xbf16>, vector<128x256xbf16>, vector<8x256xf32> -> vector<8x256xf32>
    %221 = arith.addf %220, %14 : vector<8x256xf32>
    %222 = arith.index_cast %212 : i32 to index
    %c0_96 = arith.constant 0 : index
    %223 = vector.load %arg7[%222, %c0_96] : memref<128x256xf32, #tpu.memory_space<vmem>>, vector<8x256xf32>
    tpu.vector_store %arg7[%222, %c0_96], %221 {strides = array<i32>} : memref<128x256xf32, #tpu.memory_space<vmem>>, vector<8x256xf32>,
    %c16_i32 = arith.constant 16 : i32
    %c0_97 = arith.constant 0 : index
    %c0_98 = arith.constant 0 : index
    %224 = vector.load %arg8[%c0_97, %c0_98] : memref<8x128xf32, #tpu.memory_space<vmem>>, vector<8x128xf32>
    tpu.vector_store %arg8[%c0_97, %c0_98], %218 {strides = array<i32>} : memref<8x128xf32, #tpu.memory_space<vmem>>, vector<8x128xf32>,
    return
  }
  func.func @transform_0(%arg0: i32) -> (i32, i32) {
    %c0_i32 = arith.constant 0 : i32
    %c0_i32_0 = arith.constant 0 : i32
    return %arg0, %c0_i32 : i32, i32
  }
  func.func @transform_1(%arg0: i32) -> (i32, i32) {
    %c0_i32 = arith.constant 0 : i32
    %c0_i32_0 = arith.constant 0 : i32
    %c0_i32_1 = arith.constant 0 : i32
    return %c0_i32, %c0_i32_0 : i32, i32
  }
  func.func @transform_2(%arg0: i32) -> (i32, i32) {
    %c0_i32 = arith.constant 0 : i32
    %c0_i32_0 = arith.constant 0 : i32
    %c0_i32_1 = arith.constant 0 : i32
    return %c0_i32, %c0_i32_0 : i32, i32
  }
  func.func @transform_3(%arg0: i32) -> (i32, i32) {
    %c0_i32 = arith.constant 0 : i32
    %c0_i32_0 = arith.constant 0 : i32
    %c0_i32_1 = arith.constant 0 : i32
    return %c0_i32, %c0_i32_0 : i32, i32
  }
  func.func @transform_4(%arg0: i32) -> (i32, i32) {
    %c0_i32 = arith.constant 0 : i32
    %c0_i32_0 = arith.constant 0 : i32
    %c0_i32_1 = arith.constant 0 : i32
    return %c0_i32, %c0_i32_0 : i32, i32
  }
  func.func @transform_5(%arg0: i32) -> (i32, i32) {
    %c0_i32 = arith.constant 0 : i32
    %c0_i32_0 = arith.constant 0 : i32
    %c0_i32_1 = arith.constant 0 : i32
    return %c0_i32, %c0_i32_0 : i32, i32
  }
  func.func @transform_6(%arg0: i32) -> (i32, i32) {
    %c0_i32 = arith.constant 0 : i32
    %c0_i32_0 = arith.constant 0 : i32
    return %arg0, %c0_i32 : i32, i32
  }
}

</mosaic_0001>

<bundles_post_ra>
// kernel: tpu_custom_call.1
= control target key start
LH: loop header
LB: loop body
LE: loop exit
PB: predicated region body
PF: predicated region fallthrough
CT: control target
= control target key end

     0   :  { %11 = vsyncpa [#allocation5], 0  ;;  %s3606_s0 = inlined_call_operand.hbm [shape: bf16[128,128], index: 0, kind: input, shape index: {}]   ;;  %s3607_s1 = inlined_call_operand.hbm [shape: bf16[128,128], index: 1, kind: input, shape index: {}]   ;;  %s3608_s2 = inlined_call_operand.hbm [shape: bf16[128,128], index: 2, kind: input, shape index: {}]   ;;  %s3609_s3 = inlined_call_operand.vmem [shape: f32[1,128], index: 3, kind: input, shape index: {}]   ;;  %s3610_s4 = inlined_call_operand.hbm [shape: bf16[128,256], index: 4, kind: input, shape index: {}]   ;;  %s3611_s5 = inlined_call_operand.vmem [shape: f32[1,256], index: 5, kind: input, shape index: {}]   ;;  %s3612_s6 = inlined_call_operand.hbm [shape: f32[128,256], index: 6, kind: output, shape index: {}]  }
   0x1   :  { %12 = vsyncpa [#allocation8], 0 }
   0x2   :  { %13 = vsyncpa [#allocation11], 0 }
   0x3   :  { %14 = vsyncpa [#allocation6], 0  ;;  %s2778_s21 = smov [#allocation7]   ;;  %s2779_s23 = smov [#allocation4]  }
   0x4   :  { %s32_s22 = sshll.u32 %s2778_s21, 4  ;;  %s20_s24 = sshll.u32 %s2779_s23, 4  ;;  %s33_s22 = int_to_ptr.vmem [resolvable:$true] %s32_s22  ;;  %s21_s24 = int_to_ptr.vmem [resolvable:$true] %s20_s24 }
   0x5   :  { %s2678_s25 = scalar_lea.vmem %s33_s22, 1024  ;;  %p2683_p1 = scmp.lt.s32.totalorder %s33_s22, %s33_s22 }
   0x6   :  { %p2679_p0 = scmp.ne.s32.totalorder %s33_s22, %s2678_s25  ;;  %p2684_p2 = scmp.lt.s32.totalorder %s2678_s25, %s2678_s25 }
   0x8   :  { %p2685_p3 = por %p2684_p2, %p2683_p1 }
   0xa   :  { %p2686_p4 = pnand %p2685_p3, %p2679_p0 }
   0xc   :  { %2689 = shalt.err (!%p2686_p4)
}
   0xd   :  { %s2780_s26 = smov 64   ;;  %s2781_s27 = smov 4  }
   0xe   :  { %38 = dma.hbm_to_vmem [thread:$0]  %s3607_s1, 1024, %s33_s22, [#allocation8], %s2780_s26, %s2780_s26, %s2781_s27  }
   0xf   :  { %s2698_s30 = scalar_lea.vmem %s21_s24, 1024  ;;  %p2703_p6 = scmp.lt.s32.totalorder %s21_s24, %s21_s24 }
  0x10   :  { %p2699_p5 = scmp.ne.s32.totalorder %s21_s24, %s2698_s30  ;;  %p2704_p7 = scmp.lt.s32.totalorder %s2698_s30, %s2698_s30 }
  0x12   :  { %p2705_p8 = por %p2704_p7, %p2703_p6 }
  0x14   :  { %p2706_p9 = pnand %p2705_p8, %p2699_p5 }
  0x16   :  { %2709 = shalt.err (!%p2706_p9)
}
  0x17   :  { %26 = dma.hbm_to_vmem [thread:$0]  %s3606_s0, 1024, %s21_s24, [#allocation5], %s2780_s26, %s2780_s26, %s2781_s27  }
  0x18   :  { %s2782_s9 = smov [#allocation9]   ;;  %s2783_s11 = smov [#allocation10]  }
  0x19   :  { %s44_s10 = sshll.u32 %s2782_s9, 4  ;;  %s58_s12 = sshll.u32 %s2783_s11, 4  ;;  %s45_s10 = int_to_ptr.vmem [resolvable:$true] %s44_s10  ;;  %s59_s12 = int_to_ptr.vmem [resolvable:$true] %s58_s12 }
  0x1a   :  { %s2718_s13 = scalar_lea.vmem %s45_s10, 1024  ;;  %p2723_p11 = scmp.lt.s32.totalorder %s45_s10, %s45_s10 }
  0x1b   :  { %p2719_p10 = scmp.ne.s32.totalorder %s45_s10, %s2718_s13  ;;  %p2724_p12 = scmp.lt.s32.totalorder %s2718_s13, %s2718_s13 }
  0x1d   :  { %p2725_p13 = por %p2724_p12, %p2723_p11 }
  0x1f   :  { %p2726_p0 = pnand %p2725_p13, %p2719_p10 }
  0x21   :  { %2729 = shalt.err (!%p2726_p0)
}
  0x22   :  { %50 = dma.hbm_to_vmem [thread:$0]  %s3608_s2, 1024, %s45_s10, [#allocation8], %s2780_s26, %s2780_s26, %s2781_s27  }
  0x23   :  { %s2738_s15 = scalar_lea.vmem %s59_s12, 2048  ;;  %p2743_p2 = scmp.lt.s32.totalorder %s59_s12, %s59_s12 }
  0x24   :  { %p2739_p1 = scmp.ne.s32.totalorder %s59_s12, %s2738_s15  ;;  %p2744_p3 = scmp.lt.s32.totalorder %s2738_s15, %s2738_s15 }
  0x26   :  { %p2745_p4 = por %p2744_p3, %p2743_p2 }
  0x28   :  { %p2746_p5 = pnand %p2745_p4, %p2739_p1 }
  0x2a   :  { %2749 = shalt.err (!%p2746_p5)
}
  0x2b   :  { %s2784_s0 = smov 128   ;;  %s2785_s16 = smov 8  }
  0x2c   :  { %64 = dma.hbm_to_vmem [thread:$0]  %s3610_s4, 2048, %s59_s12, [#allocation11], %s2784_s0, %s2784_s0, %s2785_s16  }
  0x2d   :  { %2770 = dma.done.wait [#allocation5], 1024  }
  0x2e   :  { %2771 = vsyncadd [#allocation5], 4294966272 }
  0x2f   :  { %2772 = dma.done.wait [#allocation8], 2048  }
  0x30   :  { %2773 = vsyncadd [#allocation8], 4294965248 }
  0x31   :  { %2774 = dma.done.wait [#allocation11], 2048  }
  0x32   :  { %2775 = vsyncadd [#allocation11], 4294965248  ;;  %v2786_v0 = vmov 0.0   ;;  %vm2787_vm0 = vmmov 0   ;;  %v2565_v1 = vld [vmem:[#allocation7 + $0x38] sm:$0xff]   ;;  %v2567_v3 = vld [vmem:[#allocation7 + $0x30] sm:$0xff]  }
  0x33   :  { %2230 = vmatprep.subr.bf16.mxu1 %v2786_v0  ;;  %2246 = vmatprep.mubr.msk.bf16.mxu1 %vm2787_vm0, %v2786_v0  ;;  %v2843_v2 = vld [vmem:[#allocation9 + $0x38] sm:$0xff]   ;;  %v2846_v4 = vld [vmem:[#allocation9 + $0x30] sm:$0xff]   ;;  %v2569_v5 = vld [vmem:[#allocation7 + $0x28] sm:$0xff]   ;;  %v2788_v23 = vmov 0.0|0.0   ;;  %v2789_v42 = vmov 0  }
  0x34   :  { %2198 = vmatprep.subr.bf16.mxu0 %v2565_v1  ;;  %2231 = vmatpush3.bf16.msra.mxu1 %v2843_v2  ;;  %v2850_v6 = vld [vmem:[#allocation9 + $0x28] sm:$0xff]   ;;  %v2571_v7 = vld [vmem:[#allocation7 + $0x20] sm:$0xff]   ;;  %v2573_v9 = vld [vmem:[#allocation7 + $0x18] sm:$0xff]  }
  0x35   :  { %2199 = vmatpush3.bf16.msra.mxu0 %v2565_v1  ;;  %2232 = vmatprep.subr.bf16.mxu1 %v2786_v0  ;;  %v2854_v8 = vld [vmem:[#allocation9 + $0x20] sm:$0xff]   ;;  %v2857_v10 = vld [vmem:[#allocation9 + $0x18] sm:$0xff]   ;;  %v2575_v11 = vld [vmem:[#allocation7 + $0x10] sm:$0xff]  }
  0x36   :  { %2200 = vmatprep.subr.bf16.mxu0 %v2567_v3  ;;  %v2581_v12 = vld [vmem:[#allocation4] sm:$0xff]   ;;  %v2862_v13 = vld [vmem:[#allocation9 + $0x10] sm:$0xff]   ;;  %v2577_v14 = vld [vmem:[#allocation7 + $0x8] sm:$0xff]  }
  0x37   :  { %2214 = vmatprep.mubr.bf16.mxu0 %v2581_v12  ;;  %v2865_v15 = vld [vmem:[#allocation9 + $0x8] sm:$0xff]   ;;  %v2579_v16 = vld [vmem:[#allocation7] sm:$0xff]   ;;  %v2871_v18 = vld [vmem:[#allocation10 + $0x74] ss:$8 sps:$4 sm:$0xff]  }
  0x38   :  { %2233 = vmatpush3.bf16.msra.mxu1 %v2846_v4  ;;  %v2869_v17 = vld [vmem:[#allocation9] sm:$0xff]   ;;  %v2582_v19 = vld [vmem:[#allocation4 + $0x8] sm:$0xff]   ;;  %v2876_v20 = vld [vmem:[#allocation10 + $0x70] ss:$8 sps:$4 sm:$0xff]  }
  0x39   :  { %2201 = vmatpush3.bf16.msra.mxu0 %v2567_v3  ;;  %2234 = vmatprep.subr.bf16.mxu1 %v2786_v0  ;;  %v2880_v21 = vld [vmem:[#allocation10 + $0x64] ss:$8 sps:$4 sm:$0xff]   ;;  %v2589_v22 = vld [vmem:[#allocation4 + $0x10] sm:$0xff]   ;;  %v2884_v24 = vld [vmem:[#allocation10 + $0x60] ss:$8 sps:$4 sm:$0xff]   ;;  %v367_v3 = vlaneseq }
  0x3a   :  { %2202 = vmatprep.subr.bf16.mxu0 %v2569_v5  ;;  %v2590_v25 = vld [vmem:[#allocation4 + $0x18] sm:$0xff]   ;;  %v2911_v28 = vld [vmem:[#allocation10 + $0x44] ss:$8 sps:$4 sm:$0xff]   ;;  %v2913_v29 = vld [vmem:[#allocation10 + $0x40] ss:$8 sps:$4 sm:$0xff]  }
  0x3b   :  { %v2905_v26 = vld [vmem:[#allocation10 + $0x54] ss:$8 sps:$4 sm:$0xff]   ;;  %v2907_v27 = vld [vmem:[#allocation10 + $0x50] ss:$8 sps:$4 sm:$0xff]   ;;  %v2597_v30 = vld [vmem:[#allocation4 + $0x20] sm:$0xff]  }
  0x3c   :  { %2235 = vmatpush3.bf16.msra.mxu1 %v2850_v6  ;;  %v2598_v31 = vld [vmem:[#allocation4 + $0x28] sm:$0xff]   ;;  %v2917_v32 = vld [vmem:[#allocation10 + $0x34] ss:$8 sps:$4 sm:$0xff]   ;;  %v2919_v33 = vld [vmem:[#allocation10 + $0x30] ss:$8 sps:$4 sm:$0xff]  }
  0x3d   :  { %2203 = vmatpush3.bf16.msra.mxu0 %v2569_v5  ;;  %2236 = vmatprep.subr.bf16.mxu1 %v2786_v0  ;;  %v2923_v34 = vld [vmem:[#allocation10 + $0x24] ss:$8 sps:$4 sm:$0xff]   ;;  %v2925_v35 = vld [vmem:[#allocation10 + $0x20] ss:$8 sps:$4 sm:$0xff]   ;;  %v2605_v36 = vld [vmem:[#allocation4 + $0x30] sm:$0xff]  }
  0x3e   :  { %2204 = vmatprep.subr.bf16.mxu0 %v2571_v7  ;;  %v2606_v37 = vld [vmem:[#allocation4 + $0x38] sm:$0xff]   ;;  %v2935_v40 = vld [vmem:[#allocation10 + $0x4] ss:$8 sps:$4 sm:$0xff]   ;;  %v2937_v41 = vld [vmem:[#allocation10] ss:$8 sps:$4 sm:$0xff]  }
  0x3f   :  { %v2929_v38 = vld [vmem:[#allocation10 + $0x14] ss:$8 sps:$4 sm:$0xff]   ;;  %v2931_v39 = vld [vmem:[#allocation10 + $0x10] ss:$8 sps:$4 sm:$0xff]   ;;  %v2948_v45 = vld [vmem:[%s3609_s3] ss:$0 sm:$0xff] }
  0x40   :  { %2237 = vmatpush3.bf16.msra.mxu1 %v2854_v8  ;;  %v365_v12 = vld [vmem:[%s3611_s5] sm:$0x3] }
  0x41   :  { %2205 = vmatpush3.bf16.msra.mxu0 %v2571_v7  ;;  %2238 = vmatprep.subr.bf16.mxu1 %v2786_v0  ;;  %v368_v7 = vshrl.u32 %v367_v3, 7 }
  0x42   :  { %2206 = vmatprep.subr.bf16.mxu0 %v2573_v9 }
  0x44   :  { %2239 = vmatpush3.bf16.msra.mxu1 %v2857_v10 }
  0x45   :  { %2207 = vmatpush3.bf16.msra.mxu0 %v2573_v9  ;;  %2240 = vmatprep.subr.bf16.mxu1 %v2786_v0 }
  0x46   :  { %2208 = vmatprep.subr.bf16.mxu0 %v2575_v11 }
  0x48   :  { %2241 = vmatpush3.bf16.msra.mxu1 %v2862_v13 }
  0x49   :  { %2209 = vmatpush3.bf16.msra.mxu0 %v2575_v11  ;;  %2242 = vmatprep.subr.bf16.mxu1 %v2786_v0  ;;  %v369_v11 = vsub.s32 0, %v368_v7 }
  0x4a   :  { %2210 = vmatprep.subr.bf16.mxu0 %v2577_v14 }
  0x4c   :  { %2243 = vmatpush3.bf16.msra.mxu1 %v2865_v15 }
  0x4d   :  { %2211 = vmatpush3.bf16.msra.mxu0 %v2577_v14  ;;  %2244 = vmatprep.subr.bf16.mxu1 %v2786_v0  ;;  %v373_v14 = vsub.s32 1, %v368_v7 }
  0x4e   :  { %2212 = vmatprep.subr.bf16.mxu0 %v2579_v16 }
  0x50   :  { %2245 = vmatpush3.bf16.msra.mxu1 %v2869_v17 }
  0x51   :  { %2213 = vmatpush3.bf16.msra.mxu0 %v2579_v16  ;;  %2250 = vmatprep.subr.bf16.mxu1 %v2786_v0 }
  0x52   :  { %551 = vmatprep.subr.bf16.mxu0 %v2871_v18 }
  0x53   :  { %2247 = vmatmul.mubr.bf16.vlgmr.msra.gmra.mxu1 %v2788_v23  ;;  %v3018_v23 = vrot.slane %v365_v12, %v373_v14 }
  0x54   :  { %2215 = vmatmul.mubr.bf16.vlgmr.msra.gmra.mxu0 %v2582_v19  ;;  %2251 = vmatpush3.bf16.msra.mxu1 %v2843_v2  ;;  %v3015_v19 = vrot.slane %v365_v12, %v369_v11 }
  0x55   :  { %552 = vmatpush1.bf16.msra.mxu0 %v2876_v20  ;;  %2252 = vmatprep.subr.bf16.mxu1 %v2786_v0 }
  0x56   :  { %553 = vmatprep.subr.bf16.mxu0 %v2880_v21  ;;  %2218 = vmatprep.mubr.bf16.mxu0 %v2589_v22 }
  0x57   :  { %2266 = vmatprep.mubr.msk.bf16.mxu1 %vm2787_vm0, %v2786_v0 }
  0x58   :  { %2253 = vmatpush3.bf16.msra.mxu1 %v2846_v4 }
  0x59   :  { %554 = vmatpush1.bf16.msra.mxu0 %v2884_v24  ;;  %2254 = vmatprep.subr.bf16.mxu1 %v2786_v0 }
  0x5a   :  { %555 = vmatprep.subr.bf16.mxu0 %v2905_v26 }
  0x5c   :  { %2219 = vmatmul.mubr.bf16.gmra.mxu0 %v2590_v25  ;;  %2255 = vmatpush3.bf16.msra.mxu1 %v2850_v6 }
  0x5d   :  { %2256 = vmatprep.subr.bf16.mxu1 %v2786_v0  ;;  %556 = vmatpush1.bf16.msra.mxu0 %v2907_v27 }
  0x5e   :  { %557 = vmatprep.subr.bf16.mxu0 %v2911_v28  ;;  %2222 = vmatprep.mubr.bf16.mxu0 %v2597_v30 }
  0x60   :  { %2257 = vmatpush3.bf16.msra.mxu1 %v2854_v8 }
  0x61   :  { %2258 = vmatprep.subr.bf16.mxu1 %v2786_v0  ;;  %558 = vmatpush1.bf16.msra.mxu0 %v2913_v29 }
  0x62   :  { %559 = vmatprep.subr.bf16.mxu0 %v2917_v32 }
  0x64   :  { %2259 = vmatpush3.bf16.msra.mxu1 %v2857_v10  ;;  %2223 = vmatmul.mubr.bf16.gmra.mxu0 %v2598_v31 }
  0x65   :  { %2260 = vmatprep.subr.bf16.mxu1 %v2786_v0  ;;  %560 = vmatpush1.bf16.msra.mxu0 %v2919_v33 }
  0x66   :  { %561 = vmatprep.subr.bf16.mxu0 %v2923_v34  ;;  %2226 = vmatprep.mubr.bf16.mxu0 %v2605_v36 }
  0x68   :  { %2261 = vmatpush3.bf16.msra.mxu1 %v2862_v13 }
  0x69   :  { %2262 = vmatprep.subr.bf16.mxu1 %v2786_v0  ;;  %562 = vmatpush1.bf16.msra.mxu0 %v2925_v35 }
  0x6a   :  { %563 = vmatprep.subr.bf16.mxu0 %v2929_v38 }
  0x6c   :  { %2263 = vmatpush3.bf16.msra.mxu1 %v2865_v15  ;;  %2227 = vmatmul.mubr.bf16.gmra.mxu0 %v2606_v37 }
  0x6d   :  { %2264 = vmatprep.subr.bf16.mxu1 %v2786_v0  ;;  %564 = vmatpush1.bf16.msra.mxu0 %v2931_v39 }
  0x6e   :  { %565 = vmatprep.subr.bf16.mxu0 %v2935_v40  ;;  %583 = vmatprep.mubr.bf16.mxu0 %v2789_v42 }
  0x70   :  { %2265 = vmatpush3.bf16.msra.mxu1 %v2869_v17 }
  0x71   :  { %2270 = vmatprep.subr.bf16.mxu1 %v2786_v0  ;;  %566 = vmatpush1.bf16.msra.mxu0 %v2937_v41 }
  0x72   :  { %642 = vmatprep.subr.bf16.mxu0 %v2871_v18 }
 0x113   :  { %v462_v43 = vpop.f32.mrf.mxu1 }
 0x114   :  { %v2943_v44 = vpop.f32.mrf.mxu0 }
 0x115   :  { %v2248_v46 = vpop.f32.mrf.mxu1 }
 0x116   :  { %v254_v47 = vpop.f32.mrf.mxu0 }
 0x117   :  { %v255_v48 = vadd.f32 %v2948_v45, %v254_v47  ;;  %v465_v49 = vpop.f32.mrf.mxu1 }
 0x118   :  { %v2986_v54 = vpop.f32.mrf.mxu0 }
 0x119   :  { %v468_v50 = vadd.f32 %v462_v43, %v255_v48  ;;  %v2249_v51 = vpop.f32.mrf.mxu1 }
 0x11a   :  { %v257_v55 = vpop.f32.mrf.mxu0 }
 0x11b   :  { %2613 = vtanh.f32 %v468_v50  ;;  %v258_v22 = vadd.f32 %v2948_v45, %v257_v55 }
 0x11c   :  { %v2988_v56 = vpop.f32.mrf.mxu0 }
 0x11e   :  { %v2990_v57 = vpop.f32.mrf.mxu0 }
 0x120   :  { %v2992_v58 = vpop.f32.mrf.mxu0 }
 0x122   :  { %v2994_v59 = vpop.f32.mrf.mxu0 }
 0x124   :  { %v2996_v60 = vpop.f32.mrf.mxu0 }
 0x126   :  { %v2998_v61 = vpop.f32.mrf.mxu0 }
 0x128   :  { %v2614_v52 = vpop.eup %2613  ;;  %v3000_v62 = vpop.f32.mrf.mxu0 }
 0x129   :  { %v470_v53 = vpack.c.bf16 %v2614_v52, %v2614_v52 }
 0x12a   :  { %v3002_v63 = vpop.f32.mrf.mxu0 }
 0x12b   :  { %584 = vmatmul.mubr.bf16.vlgmr.msra.gmra.mxu0 %v470_v53  ;;  %2267 = vmatmul.mubr.bf16.vlgmr.msra.gmra.mxu1 %v470_v53  ;;  %v263_v53 = vadd.f32 %v2943_v44, %v2948_v45  ;;  %v266_v44 = vadd.f32 %v2986_v54, %v2948_v45  ;;  %v271_v54 = vadd.f32 %v2948_v45, %v2990_v57 }
 0x12c   :  { %643 = vmatpush1.bf16.msra.mxu0 %v2876_v20  ;;  %2271 = vmatpush3.bf16.msra.mxu1 %v2843_v2  ;;  %v3004_v1 = vpop.f32.mrf.mxu0  ;;  %v274_v57 = vadd.f32 %v2948_v45, %v2994_v59 }
 0x12d   :  { %644 = vmatprep.subr.bf16.mxu0 %v2880_v21  ;;  %2272 = vmatprep.subr.bf16.mxu1 %v2786_v0 }
 0x12e   :  { %674 = vmatprep.mubr.bf16.mxu0 %v2789_v42  ;;  %2286 = vmatprep.mubr.msk.bf16.mxu1 %vm2787_vm0, %v2786_v0  ;;  %v3006_v5 = vpop.f32.mrf.mxu0 }
 0x130   :  { %645 = vmatpush1.bf16.msra.mxu0 %v2884_v24  ;;  %2273 = vmatpush3.bf16.msra.mxu1 %v2846_v4  ;;  %v3008_v9 = vpop.f32.mrf.mxu0 }
 0x131   :  { %646 = vmatprep.subr.bf16.mxu0 %v2905_v26  ;;  %2274 = vmatprep.subr.bf16.mxu1 %v2786_v0 }
 0x132   :  { %v3013_v16 = vpop.f32.mrf.mxu0 }
 0x134   :  { %647 = vmatpush1.bf16.msra.mxu0 %v2907_v27  ;;  %2275 = vmatpush3.bf16.msra.mxu1 %v2850_v6 }
 0x135   :  { %648 = vmatprep.subr.bf16.mxu0 %v2911_v28  ;;  %2276 = vmatprep.subr.bf16.mxu1 %v2786_v0 }
 0x138   :  { %649 = vmatpush1.bf16.msra.mxu0 %v2913_v29  ;;  %2277 = vmatpush3.bf16.msra.mxu1 %v2854_v8 }
 0x139   :  { %650 = vmatprep.subr.bf16.mxu0 %v2917_v32  ;;  %2278 = vmatprep.subr.bf16.mxu1 %v2786_v0 }
 0x13c   :  { %651 = vmatpush1.bf16.msra.mxu0 %v2919_v33  ;;  %2279 = vmatpush3.bf16.msra.mxu1 %v2857_v10 }
 0x13d   :  { %652 = vmatprep.subr.bf16.mxu0 %v2923_v34  ;;  %2280 = vmatprep.subr.bf16.mxu1 %v2786_v0 }
 0x140   :  { %653 = vmatpush1.bf16.msra.mxu0 %v2925_v35  ;;  %2281 = vmatpush3.bf16.msra.mxu1 %v2862_v13 }
 0x141   :  { %654 = vmatprep.subr.bf16.mxu0 %v2929_v38  ;;  %2282 = vmatprep.subr.bf16.mxu1 %v2786_v0 }
 0x144   :  { %655 = vmatpush1.bf16.msra.mxu0 %v2931_v39  ;;  %2283 = vmatpush3.bf16.msra.mxu1 %v2865_v15 }
 0x145   :  { %656 = vmatprep.subr.bf16.mxu0 %v2935_v40  ;;  %2284 = vmatprep.subr.bf16.mxu1 %v2786_v0 }
 0x148   :  { %657 = vmatpush1.bf16.msra.mxu0 %v2937_v41  ;;  %2285 = vmatpush3.bf16.msra.mxu1 %v2869_v17 }
 0x149   :  { %733 = vmatprep.subr.bf16.mxu0 %v2871_v18  ;;  %2290 = vmatprep.subr.bf16.mxu1 %v2786_v0 }
 0x1eb   :  { %v585_v25 = vpop.f32.mrf.mxu0  ;;  %v633_v30 = vpop.f32.mrf.mxu1 }
 0x1ec   :  { %v586_v31 = vadd.f32 %v585_v25, %v3015_v19  ;;  %v639_v36 = vadd.f32 %v633_v30, %v258_v22 }
 0x1ed   :  { %v587_v37 = vpop.f32.mrf.mxu0  ;;  %v2268_v43 = vpop.f32.mrf.mxu1 }
 0x1ee   :  { %595 = vst [vmem:[#allocation12] sm:$0xff] %v586_v31  ;;  %2615 = vtanh.f32 %v639_v36  ;;  %v588_v46 = vadd.f32 %v587_v37, %v3018_v23 }
 0x1ef   :  { %v589_v47 = vpop.f32.mrf.mxu0  ;;  %v636_v48 = vpop.f32.mrf.mxu1 }
 0x1f0   :  { %596 = vst [vmem:[#allocation12 + $0x8] sm:$0xff] %v588_v46 }
 0x1f1   :  { %v590_v49 = vpop.f32.mrf.mxu0  ;;  %v2269_v50 = vpop.f32.mrf.mxu1 }
 0x1fb   :  { %v2616_v51 = vpop.eup %2615 }
 0x1fc   :  { %v641_v52 = vpack.c.bf16 %v2616_v51, %v2616_v51 }
 0x1fe   :  { %675 = vmatmul.mubr.bf16.vlgmr.msra.gmra.mxu0 %v641_v52  ;;  %2287 = vmatmul.mubr.bf16.vlgmr.msra.gmra.mxu1 %v641_v52 }
 0x1ff   :  { %734 = vmatpush1.bf16.msra.mxu0 %v2876_v20  ;;  %2291 = vmatpush3.bf16.msra.mxu1 %v2843_v2 }
 0x200   :  { %735 = vmatprep.subr.bf16.mxu0 %v2880_v21  ;;  %2292 = vmatprep.subr.bf16.mxu1 %v2786_v0 }
 0x201   :  { %765 = vmatprep.mubr.bf16.mxu0 %v2789_v42  ;;  %2306 = vmatprep.mubr.msk.bf16.mxu1 %vm2787_vm0, %v2786_v0 }
 0x203   :  { %736 = vmatpush1.bf16.msra.mxu0 %v2884_v24  ;;  %2293 = vmatpush3.bf16.msra.mxu1 %v2846_v4 }
 0x204   :  { %737 = vmatprep.subr.bf16.mxu0 %v2905_v26  ;;  %2294 = vmatprep.subr.bf16.mxu1 %v2786_v0 }
 0x207   :  { %738 = vmatpush1.bf16.msra.mxu0 %v2907_v27  ;;  %2295 = vmatpush3.bf16.msra.mxu1 %v2850_v6 }
 0x208   :  { %739 = vmatprep.subr.bf16.mxu0 %v2911_v28  ;;  %2296 = vmatprep.subr.bf16.mxu1 %v2786_v0 }
 0x20b   :  { %740 = vmatpush1.bf16.msra.mxu0 %v2913_v29  ;;  %2297 = vmatpush3.bf16.msra.mxu1 %v2854_v8 }
 0x20c   :  { %741 = vmatprep.subr.bf16.mxu0 %v2917_v32  ;;  %2298 = vmatprep.subr.bf16.mxu1 %v2786_v0 }
 0x20f   :  { %742 = vmatpush1.bf16.msra.mxu0 %v2919_v33  ;;  %2299 = vmatpush3.bf16.msra.mxu1 %v2857_v10 }
 0x210   :  { %743 = vmatprep.subr.bf16.mxu0 %v2923_v34  ;;  %2300 = vmatprep.subr.bf16.mxu1 %v2786_v0 }
 0x213   :  { %744 = vmatpush1.bf16.msra.mxu0 %v2925_v35  ;;  %2301 = vmatpush3.bf16.msra.mxu1 %v2862_v13 }
 0x214   :  { %745 = vmatprep.subr.bf16.mxu0 %v2929_v38  ;;  %2302 = vmatprep.subr.bf16.mxu1 %v2786_v0 }
 0x217   :  { %746 = vmatpush1.bf16.msra.mxu0 %v2931_v39  ;;  %2303 = vmatpush3.bf16.msra.mxu1 %v2865_v15 }
 0x218   :  { %747 = vmatprep.subr.bf16.mxu0 %v2935_v40  ;;  %2304 = vmatprep.subr.bf16.mxu1 %v2786_v0 }
 0x21b   :  { %748 = vmatpush1.bf16.msra.mxu0 %v2937_v41  ;;  %2305 = vmatpush3.bf16.msra.mxu1 %v2869_v17 }
 0x21c   :  { %824 = vmatprep.subr.bf16.mxu0 %v2871_v18  ;;  %2310 = vmatprep.subr.bf16.mxu1 %v2786_v0 }
 0x2be   :  { %v676_v55 = vpop.f32.mrf.mxu0  ;;  %v724_v3 = vpop.f32.mrf.mxu1 }
 0x2bf   :  { %v677_v7 = vadd.f32 %v676_v55, %v3015_v19  ;;  %v730_v11 = vadd.f32 %v724_v3, %v263_v53 }
 0x2c0   :  { %v678_v12 = vpop.f32.mrf.mxu0  ;;  %v2288_v14 = vpop.f32.mrf.mxu1 }
 0x2c1   :  { %686 = vst [vmem:[#allocation12 + $0x10] sm:$0xff] %v677_v7  ;;  %2617 = vtanh.f32 %v730_v11  ;;  %v679_v22 = vadd.f32 %v678_v12, %v3018_v23 }
 0x2c2   :  { %v680_v25 = vpop.f32.mrf.mxu0  ;;  %v727_v30 = vpop.f32.mrf.mxu1 }
 0x2c3   :  { %687 = vst [vmem:[#allocation12 + $0x18] sm:$0xff] %v679_v22 }
 0x2c4   :  { %v681_v31 = vpop.f32.mrf.mxu0  ;;  %v2289_v36 = vpop.f32.mrf.mxu1 }
 0x2ce   :  { %v2618_v37 = vpop.eup %2617 }
 0x2cf   :  { %v732_v43 = vpack.c.bf16 %v2618_v37, %v2618_v37 }
 0x2d1   :  { %766 = vmatmul.mubr.bf16.vlgmr.msra.gmra.mxu0 %v732_v43  ;;  %2307 = vmatmul.mubr.bf16.vlgmr.msra.gmra.mxu1 %v732_v43 }
 0x2d2   :  { %825 = vmatpush1.bf16.msra.mxu0 %v2876_v20  ;;  %2311 = vmatpush3.bf16.msra.mxu1 %v2843_v2 }
 0x2d3   :  { %826 = vmatprep.subr.bf16.mxu0 %v2880_v21  ;;  %2312 = vmatprep.subr.bf16.mxu1 %v2786_v0 }
 0x2d4   :  { %856 = vmatprep.mubr.bf16.mxu0 %v2789_v42  ;;  %2326 = vmatprep.mubr.msk.bf16.mxu1 %vm2787_vm0, %v2786_v0 }
 0x2d6   :  { %827 = vmatpush1.bf16.msra.mxu0 %v2884_v24  ;;  %2313 = vmatpush3.bf16.msra.mxu1 %v2846_v4 }
 0x2d7   :  { %828 = vmatprep.subr.bf16.mxu0 %v2905_v26  ;;  %2314 = vmatprep.subr.bf16.mxu1 %v2786_v0 }
 0x2da   :  { %829 = vmatpush1.bf16.msra.mxu0 %v2907_v27  ;;  %2315 = vmatpush3.bf16.msra.mxu1 %v2850_v6 }
 0x2db   :  { %830 = vmatprep.subr.bf16.mxu0 %v2911_v28  ;;  %2316 = vmatprep.subr.bf16.mxu1 %v2786_v0 }
 0x2de   :  { %831 = vmatpush1.bf16.msra.mxu0 %v2913_v29  ;;  %2317 = vmatpush3.bf16.msra.mxu1 %v2854_v8 }
 0x2df   :  { %832 = vmatprep.subr.bf16.mxu0 %v2917_v32  ;;  %2318 = vmatprep.subr.bf16.mxu1 %v2786_v0 }
 0x2e2   :  { %833 = vmatpush1.bf16.msra.mxu0 %v2919_v33  ;;  %2319 = vmatpush3.bf16.msra.mxu1 %v2857_v10 }
 0x2e3   :  { %834 = vmatprep.subr.bf16.mxu0 %v2923_v34  ;;  %2320 = vmatprep.subr.bf16.mxu1 %v2786_v0 }
 0x2e6   :  { %835 = vmatpush1.bf16.msra.mxu0 %v2925_v35  ;;  %2321 = vmatpush3.bf16.msra.mxu1 %v2862_v13 }
 0x2e7   :  { %836 = vmatprep.subr.bf16.mxu0 %v2929_v38  ;;  %2322 = vmatprep.subr.bf16.mxu1 %v2786_v0 }
 0x2ea   :  { %837 = vmatpush1.bf16.msra.mxu0 %v2931_v39  ;;  %2323 = vmatpush3.bf16.msra.mxu1 %v2865_v15 }
 0x2eb   :  { %838 = vmatprep.subr.bf16.mxu0 %v2935_v40  ;;  %2324 = vmatprep.subr.bf16.mxu1 %v2786_v0 }
 0x2ee   :  { %839 = vmatpush1.bf16.msra.mxu0 %v2937_v41  ;;  %2325 = vmatpush3.bf16.msra.mxu1 %v2869_v17 }
 0x2ef   :  { %915 = vmatprep.subr.bf16.mxu0 %v2871_v18  ;;  %2330 = vmatprep.subr.bf16.mxu1 %v2786_v0 }
 0x391   :  { %v767_v46 = vpop.f32.mrf.mxu0  ;;  %v815_v47 = vpop.f32.mrf.mxu1 }
 0x392   :  { %v768_v48 = vadd.f32 %v767_v46, %v3015_v19  ;;  %v821_v49 = vadd.f32 %v815_v47, %v266_v44 }
 0x393   :  { %v769_v50 = vpop.f32.mrf.mxu0  ;;  %v2308_v51 = vpop.f32.mrf.mxu1 }
 0x394   :  { %777 = vst [vmem:[#allocation12 + $0x20] sm:$0xff] %v768_v48  ;;  %2619 = vtanh.f32 %v821_v49  ;;  %v770_v52 = vadd.f32 %v769_v50, %v3018_v23 }
 0x395   :  { %v771_v53 = vpop.f32.mrf.mxu0  ;;  %v818_v55 = vpop.f32.mrf.mxu1 }
 0x396   :  { %778 = vst [vmem:[#allocation12 + $0x28] sm:$0xff] %v770_v52 }
 0x397   :  { %v772_v3 = vpop.f32.mrf.mxu0  ;;  %v2309_v7 = vpop.f32.mrf.mxu1 }
 0x3a1   :  { %v2620_v11 = vpop.eup %2619 }
 0x3a2   :  { %v823_v12 = vpack.c.bf16 %v2620_v11, %v2620_v11 }
 0x3a4   :  { %857 = vmatmul.mubr.bf16.vlgmr.msra.gmra.mxu0 %v823_v12  ;;  %2327 = vmatmul.mubr.bf16.vlgmr.msra.gmra.mxu1 %v823_v12 }
 0x3a5   :  { %916 = vmatpush1.bf16.msra.mxu0 %v2876_v20  ;;  %2331 = vmatpush3.bf16.msra.mxu1 %v2843_v2 }
 0x3a6   :  { %917 = vmatprep.subr.bf16.mxu0 %v2880_v21  ;;  %2332 = vmatprep.subr.bf16.mxu1 %v2786_v0 }
 0x3a7   :  { %947 = vmatprep.mubr.bf16.mxu0 %v2789_v42  ;;  %2346 = vmatprep.mubr.msk.bf16.mxu1 %vm2787_vm0, %v2786_v0 }
 0x3a9   :  { %918 = vmatpush1.bf16.msra.mxu0 %v2884_v24  ;;  %2333 = vmatpush3.bf16.msra.mxu1 %v2846_v4 }
 0x3aa   :  { %919 = vmatprep.subr.bf16.mxu0 %v2905_v26  ;;  %2334 = vmatprep.subr.bf16.mxu1 %v2786_v0 }
 0x3ad   :  { %920 = vmatpush1.bf16.msra.mxu0 %v2907_v27  ;;  %2335 = vmatpush3.bf16.msra.mxu1 %v2850_v6 }
 0x3ae   :  { %921 = vmatprep.subr.bf16.mxu0 %v2911_v28  ;;  %2336 = vmatprep.subr.bf16.mxu1 %v2786_v0 }
 0x3b1   :  { %922 = vmatpush1.bf16.msra.mxu0 %v2913_v29  ;;  %2337 = vmatpush3.bf16.msra.mxu1 %v2854_v8 }
 0x3b2   :  { %923 = vmatprep.subr.bf16.mxu0 %v2917_v32  ;;  %2338 = vmatprep.subr.bf16.mxu1 %v2786_v0 }
 0x3b5   :  { %924 = vmatpush1.bf16.msra.mxu0 %v2919_v33  ;;  %2339 = vmatpush3.bf16.msra.mxu1 %v2857_v10 }
 0x3b6   :  { %925 = vmatprep.subr.bf16.mxu0 %v2923_v34  ;;  %2340 = vmatprep.subr.bf16.mxu1 %v2786_v0 }
 0x3b9   :  { %926 = vmatpush1.bf16.msra.mxu0 %v2925_v35  ;;  %2341 = vmatpush3.bf16.msra.mxu1 %v2862_v13 }
 0x3ba   :  { %927 = vmatprep.subr.bf16.mxu0 %v2929_v38  ;;  %2342 = vmatprep.subr.bf16.mxu1 %v2786_v0 }
 0x3bd   :  { %928 = vmatpush1.bf16.msra.mxu0 %v2931_v39  ;;  %2343 = vmatpush3.bf16.msra.mxu1 %v2865_v15 }
 0x3be   :  { %929 = vmatprep.subr.bf16.mxu0 %v2935_v40  ;;  %2344 = vmatprep.subr.bf16.mxu1 %v2786_v0 }
 0x3c1   :  { %930 = vmatpush1.bf16.msra.mxu0 %v2937_v41  ;;  %2345 = vmatpush3.bf16.msra.mxu1 %v2869_v17 }
 0x3c2   :  { %1006 = vmatprep.subr.bf16.mxu0 %v2871_v18  ;;  %2350 = vmatprep.subr.bf16.mxu1 %v2786_v0 }
 0x464   :  { %v858_v14 = vpop.f32.mrf.mxu0  ;;  %v906_v22 = vpop.f32.mrf.mxu1 }
 0x465   :  { %v859_v25 = vadd.f32 %v858_v14, %v3015_v19  ;;  %v912_v30 = vadd.f32 %v906_v22, %v271_v54 }
 0x466   :  { %v860_v31 = vpop.f32.mrf.mxu0  ;;  %v2328_v36 = vpop.f32.mrf.mxu1 }
 0x467   :  { %868 = vst [vmem:[#allocation12 + $0x30] sm:$0xff] %v859_v25  ;;  %2621 = vtanh.f32 %v912_v30  ;;  %v861_v37 = vadd.f32 %v860_v31, %v3018_v23 }
 0x468   :  { %v862_v43 = vpop.f32.mrf.mxu0  ;;  %v909_v44 = vpop.f32.mrf.mxu1 }
 0x469   :  { %869 = vst [vmem:[#allocation12 + $0x38] sm:$0xff] %v861_v37 }
 0x46a   :  { %v863_v46 = vpop.f32.mrf.mxu0  ;;  %v2329_v47 = vpop.f32.mrf.mxu1 }
 0x474   :  { %v2622_v48 = vpop.eup %2621 }
 0x475   :  { %v914_v49 = vpack.c.bf16 %v2622_v48, %v2622_v48 }
 0x477   :  { %948 = vmatmul.mubr.bf16.vlgmr.msra.gmra.mxu0 %v914_v49  ;;  %2347 = vmatmul.mubr.bf16.vlgmr.msra.gmra.mxu1 %v914_v49 }
 0x478   :  { %1007 = vmatpush1.bf16.msra.mxu0 %v2876_v20  ;;  %2351 = vmatpush3.bf16.msra.mxu1 %v2843_v2 }
 0x479   :  { %1008 = vmatprep.subr.bf16.mxu0 %v2880_v21  ;;  %2352 = vmatprep.subr.bf16.mxu1 %v2786_v0 }
 0x47a   :  { %1038 = vmatprep.mubr.bf16.mxu0 %v2789_v42  ;;  %2366 = vmatprep.mubr.msk.bf16.mxu1 %vm2787_vm0, %v2786_v0 }
 0x47c   :  { %1009 = vmatpush1.bf16.msra.mxu0 %v2884_v24  ;;  %2353 = vmatpush3.bf16.msra.mxu1 %v2846_v4 }
 0x47d   :  { %1010 = vmatprep.subr.bf16.mxu0 %v2905_v26  ;;  %2354 = vmatprep.subr.bf16.mxu1 %v2786_v0 }
 0x480   :  { %1011 = vmatpush1.bf16.msra.mxu0 %v2907_v27  ;;  %2355 = vmatpush3.bf16.msra.mxu1 %v2850_v6 }
 0x481   :  { %1012 = vmatprep.subr.bf16.mxu0 %v2911_v28  ;;  %2356 = vmatprep.subr.bf16.mxu1 %v2786_v0 }
 0x484   :  { %1013 = vmatpush1.bf16.msra.mxu0 %v2913_v29  ;;  %2357 = vmatpush3.bf16.msra.mxu1 %v2854_v8 }
 0x485   :  { %1014 = vmatprep.subr.bf16.mxu0 %v2917_v32  ;;  %2358 = vmatprep.subr.bf16.mxu1 %v2786_v0 }
 0x488   :  { %1015 = vmatpush1.bf16.msra.mxu0 %v2919_v33  ;;  %2359 = vmatpush3.bf16.msra.mxu1 %v2857_v10 }
 0x489   :  { %1016 = vmatprep.subr.bf16.mxu0 %v2923_v34  ;;  %2360 = vmatprep.subr.bf16.mxu1 %v2786_v0 }
 0x48c   :  { %1017 = vmatpush1.bf16.msra.mxu0 %v2925_v35  ;;  %2361 = vmatpush3.bf16.msra.mxu1 %v2862_v13 }
 0x48d   :  { %1018 = vmatprep.subr.bf16.mxu0 %v2929_v38  ;;  %2362 = vmatprep.subr.bf16.mxu1 %v2786_v0 }
 0x490   :  { %1019 = vmatpush1.bf16.msra.mxu0 %v2931_v39  ;;  %2363 = vmatpush3.bf16.msra.mxu1 %v2865_v15 }
 0x491   :  { %1020 = vmatprep.subr.bf16.mxu0 %v2935_v40  ;;  %2364 = vmatprep.subr.bf16.mxu1 %v2786_v0 }
 0x494   :  { %1021 = vmatpush1.bf16.msra.mxu0 %v2937_v41  ;;  %2365 = vmatpush3.bf16.msra.mxu1 %v2869_v17 }
 0x495   :  { %1097 = vmatprep.subr.bf16.mxu0 %v2871_v18  ;;  %2370 = vmatprep.subr.bf16.mxu1 %v2786_v0 }
 0x537   :  { %v949_v50 = vpop.f32.mrf.mxu0  ;;  %v997_v51 = vpop.f32.mrf.mxu1 }
 0x538   :  { %v950_v52 = vadd.f32 %v949_v50, %v3015_v19  ;;  %v1003_v53 = vadd.f32 %v997_v51, %v274_v57  ;;  %v3227_v57 = vld [vmem:[#allocation9 + $0x30] sm:$0xff]   ;;  %v3233_v50 = vld [vmem:[#allocation9 + $0x28] sm:$0xff]  }
 0x539   :  { %v951_v55 = vpop.f32.mrf.mxu0  ;;  %v2348_v3 = vpop.f32.mrf.mxu1 }
 0x53a   :  { %959 = vst [vmem:[#allocation12 + $0x40] sm:$0xff] %v950_v52  ;;  %2623 = vtanh.f32 %v1003_v53  ;;  %v952_v7 = vadd.f32 %v951_v55, %v3018_v23 }
 0x53b   :  { %v953_v11 = vpop.f32.mrf.mxu0  ;;  %v1000_v12 = vpop.f32.mrf.mxu1 }
 0x53c   :  { %960 = vst [vmem:[#allocation12 + $0x48] sm:$0xff] %v952_v7 }
 0x53d   :  { %v954_v54 = vpop.f32.mrf.mxu0  ;;  %v2349_v14 = vpop.f32.mrf.mxu1 }
 0x53e   :  { %v3302_v54 = vld [vmem:[#allocation9] sm:$0xff]   ;;  %v3305_v14 = vld [vmem:[#allocation10 + $0x74] ss:$8 sps:$4 sm:$0xff]  }
 0x547   :  { %v2624_v22 = vpop.eup %2623 }
 0x548   :  { %v1005_v25 = vpack.c.bf16 %v2624_v22, %v2624_v22  ;;  %v287_v22 = vadd.f32 %v2948_v45, %v2998_v61  ;;  %v3313_v61 = vld [vmem:[#allocation10 + $0x70] ss:$8 sps:$4 sm:$0xff]  }
 0x54a   :  { %1039 = vmatmul.mubr.bf16.vlgmr.msra.gmra.mxu0 %v1005_v25  ;;  %2367 = vmatmul.mubr.bf16.vlgmr.msra.gmra.mxu1 %v1005_v25 }
 0x54b   :  { %1098 = vmatpush1.bf16.msra.mxu0 %v2876_v20  ;;  %2371 = vmatpush3.bf16.msra.mxu1 %v2843_v2  ;;  %v279_v2 = vadd.f32 %v2988_v56, %v2948_v45  ;;  %v3218_v56 = vld [vmem:[#allocation9 + $0x38] sm:$0xff]  }
 0x54c   :  { %1099 = vmatprep.subr.bf16.mxu0 %v2880_v21  ;;  %2372 = vmatprep.subr.bf16.mxu1 %v2786_v0 }
 0x54d   :  { %1129 = vmatprep.mubr.bf16.mxu0 %v2789_v42  ;;  %2386 = vmatprep.mubr.msk.bf16.mxu1 %vm2787_vm0, %v2786_v0 }
 0x54f   :  { %1100 = vmatpush1.bf16.msra.mxu0 %v2884_v24  ;;  %2373 = vmatpush3.bf16.msra.mxu1 %v2846_v4 }
 0x550   :  { %1101 = vmatprep.subr.bf16.mxu0 %v2905_v26  ;;  %2374 = vmatprep.subr.bf16.mxu1 %v2786_v0 }
 0x553   :  { %1102 = vmatpush1.bf16.msra.mxu0 %v2907_v27  ;;  %2375 = vmatpush3.bf16.msra.mxu1 %v2850_v6 }
 0x554   :  { %1103 = vmatprep.subr.bf16.mxu0 %v2911_v28  ;;  %2376 = vmatprep.subr.bf16.mxu1 %v2786_v0 }
 0x557   :  { %1104 = vmatpush1.bf16.msra.mxu0 %v2913_v29  ;;  %2377 = vmatpush3.bf16.msra.mxu1 %v2854_v8 }
 0x558   :  { %1105 = vmatprep.subr.bf16.mxu0 %v2917_v32  ;;  %2378 = vmatprep.subr.bf16.mxu1 %v2786_v0 }
 0x55b   :  { %1106 = vmatpush1.bf16.msra.mxu0 %v2919_v33  ;;  %2379 = vmatpush3.bf16.msra.mxu1 %v2857_v10 }
 0x55c   :  { %1107 = vmatprep.subr.bf16.mxu0 %v2923_v34  ;;  %2380 = vmatprep.subr.bf16.mxu1 %v2786_v0 }
 0x55f   :  { %1108 = vmatpush1.bf16.msra.mxu0 %v2925_v35  ;;  %2381 = vmatpush3.bf16.msra.mxu1 %v2862_v13 }
 0x560   :  { %1109 = vmatprep.subr.bf16.mxu0 %v2929_v38  ;;  %2382 = vmatprep.subr.bf16.mxu1 %v2786_v0 }
 0x563   :  { %1110 = vmatpush1.bf16.msra.mxu0 %v2931_v39  ;;  %2383 = vmatpush3.bf16.msra.mxu1 %v2865_v15 }
 0x564   :  { %1111 = vmatprep.subr.bf16.mxu0 %v2935_v40  ;;  %2384 = vmatprep.subr.bf16.mxu1 %v2786_v0 }
 0x567   :  { %1112 = vmatpush1.bf16.msra.mxu0 %v2937_v41  ;;  %2385 = vmatpush3.bf16.msra.mxu1 %v2869_v17 }
 0x568   :  { %1188 = vmatprep.subr.bf16.mxu0 %v2871_v18  ;;  %2390 = vmatprep.subr.bf16.mxu1 %v2786_v0 }
 0x60a   :  { %v1040_v4 = vpop.f32.mrf.mxu0  ;;  %v1088_v6 = vpop.f32.mrf.mxu1 }
 0x60b   :  { %v1041_v59 = vadd.f32 %v1040_v4, %v3015_v19  ;;  %v1094_v30 = vadd.f32 %v1088_v6, %v279_v2 }
 0x60c   :  { %v1042_v31 = vpop.f32.mrf.mxu0  ;;  %v2368_v36 = vpop.f32.mrf.mxu1 }
 0x60d   :  { %1050 = vst [vmem:[#allocation12 + $0x50] sm:$0xff] %v1041_v59  ;;  %2625 = vtanh.f32 %v1094_v30  ;;  %v1043_v37 = vadd.f32 %v1042_v31, %v3018_v23 }
 0x60e   :  { %v1044_v43 = vpop.f32.mrf.mxu0  ;;  %v1091_v44 = vpop.f32.mrf.mxu1 }
 0x60f   :  { %1051 = vst [vmem:[#allocation12 + $0x58] sm:$0xff] %v1043_v37 }
 0x610   :  { %v1045_v46 = vpop.f32.mrf.mxu0  ;;  %v2369_v47 = vpop.f32.mrf.mxu1 }
 0x61a   :  { %v2626_v48 = vpop.eup %2625 }
 0x61b   :  { %v1096_v49 = vpack.c.bf16 %v2626_v48, %v2626_v48  ;;  %v3317_v48 = vld [vmem:[#allocation10 + $0x64] ss:$8 sps:$4 sm:$0xff]  }
 0x61d   :  { %1130 = vmatmul.mubr.bf16.vlgmr.msra.gmra.mxu0 %v1096_v49  ;;  %2387 = vmatmul.mubr.bf16.vlgmr.msra.gmra.mxu1 %v1096_v49  ;;  %v3324_v49 = vld [vmem:[#allocation10 + $0x60] ss:$8 sps:$4 sm:$0xff]  }
 0x61e   :  { %1189 = vmatpush1.bf16.msra.mxu0 %v2876_v20  ;;  %2391 = vmatpush3.bf16.msra.mxu1 %v3218_v56 }
 0x61f   :  { %1190 = vmatprep.subr.bf16.mxu0 %v2880_v21  ;;  %2392 = vmatprep.subr.bf16.mxu1 %v2786_v0 }
 0x620   :  { %1220 = vmatprep.mubr.bf16.mxu0 %v2789_v42  ;;  %2406 = vmatprep.mubr.msk.bf16.mxu1 %vm2787_vm0, %v2786_v0 }
 0x622   :  { %1191 = vmatpush1.bf16.msra.mxu0 %v2884_v24  ;;  %2393 = vmatpush3.bf16.msra.mxu1 %v3227_v57 }
 0x623   :  { %1192 = vmatprep.subr.bf16.mxu0 %v2905_v26  ;;  %2394 = vmatprep.subr.bf16.mxu1 %v2786_v0 }
 0x626   :  { %1193 = vmatpush1.bf16.msra.mxu0 %v2907_v27  ;;  %2395 = vmatpush3.bf16.msra.mxu1 %v3233_v50 }
 0x627   :  { %1194 = vmatprep.subr.bf16.mxu0 %v2911_v28  ;;  %2396 = vmatprep.subr.bf16.mxu1 %v2786_v0 }
 0x62a   :  { %1195 = vmatpush1.bf16.msra.mxu0 %v2913_v29  ;;  %2397 = vmatpush3.bf16.msra.mxu1 %v2854_v8  ;;  %v282_v8 = vadd.f32 %v2992_v58, %v2948_v45  ;;  %v3296_v58 = vld [vmem:[#allocation9 + $0x8] sm:$0xff]  }
 0x62b   :  { %1196 = vmatprep.subr.bf16.mxu0 %v2917_v32  ;;  %2398 = vmatprep.subr.bf16.mxu1 %v2786_v0 }
 0x62e   :  { %1197 = vmatpush1.bf16.msra.mxu0 %v2919_v33  ;;  %2399 = vmatpush3.bf16.msra.mxu1 %v2857_v10 }
 0x62f   :  { %1198 = vmatprep.subr.bf16.mxu0 %v2923_v34  ;;  %2400 = vmatprep.subr.bf16.mxu1 %v2786_v0 }
 0x632   :  { %1199 = vmatpush1.bf16.msra.mxu0 %v2925_v35  ;;  %2401 = vmatpush3.bf16.msra.mxu1 %v2862_v13 }
 0x633   :  { %1200 = vmatprep.subr.bf16.mxu0 %v2929_v38  ;;  %2402 = vmatprep.subr.bf16.mxu1 %v2786_v0 }
 0x636   :  { %1201 = vmatpush1.bf16.msra.mxu0 %v2931_v39  ;;  %2403 = vmatpush3.bf16.msra.mxu1 %v2865_v15 }
 0x637   :  { %1202 = vmatprep.subr.bf16.mxu0 %v2935_v40  ;;  %2404 = vmatprep.subr.bf16.mxu1 %v2786_v0 }
 0x63a   :  { %1203 = vmatpush1.bf16.msra.mxu0 %v2937_v41  ;;  %2405 = vmatpush3.bf16.msra.mxu1 %v2869_v17 }
 0x63b   :  { %1279 = vmatprep.subr.bf16.mxu0 %v2871_v18  ;;  %2410 = vmatprep.subr.bf16.mxu1 %v2786_v0 }
 0x6dd   :  { %v1131_v10 = vpop.f32.mrf.mxu0  ;;  %v1179_v13 = vpop.f32.mrf.mxu1 }
 0x6de   :  { %v1132_v51 = vadd.f32 %v1131_v10, %v3015_v19  ;;  %v1185_v15 = vadd.f32 %v1179_v13, %v282_v8  ;;  %v3375_v13 = vld [vmem:[#allocation10 + $0x44] ss:$8 sps:$4 sm:$0xff]  }
 0x6df   :  { %v1133_v52 = vpop.f32.mrf.mxu0  ;;  %v2388_v53 = vpop.f32.mrf.mxu1 }
 0x6e0   :  { %1141 = vst [vmem:[#allocation12 + $0x60] sm:$0xff] %v1132_v51  ;;  %2627 = vtanh.f32 %v1185_v15  ;;  %v1134_v55 = vadd.f32 %v1133_v52, %v3018_v23  ;;  %v3379_v51 = vld [vmem:[#allocation10 + $0x40] ss:$8 sps:$4 sm:$0xff]   ;;  %v3383_v15 = vld [vmem:[#allocation10 + $0x34] ss:$8 sps:$4 sm:$0xff]  }
 0x6e1   :  { %v1135_v3 = vpop.f32.mrf.mxu0  ;;  %v1182_v17 = vpop.f32.mrf.mxu1  ;;  %v3387_v52 = vld [vmem:[#allocation10 + $0x30] ss:$8 sps:$4 sm:$0xff]   ;;  %v3391_v53 = vld [vmem:[#allocation10 + $0x24] ss:$8 sps:$4 sm:$0xff]  }
 0x6e2   :  { %1142 = vst [vmem:[#allocation12 + $0x68] sm:$0xff] %v1134_v55  ;;  %v3395_v55 = vld [vmem:[#allocation10 + $0x20] ss:$8 sps:$4 sm:$0xff]   ;;  %v3399_v3 = vld [vmem:[#allocation10 + $0x14] ss:$8 sps:$4 sm:$0xff]  }
 0x6e3   :  { %v1136_v18 = vpop.f32.mrf.mxu0  ;;  %v2389_v7 = vpop.f32.mrf.mxu1  ;;  %v3403_v17 = vld [vmem:[#allocation10 + $0x10] ss:$8 sps:$4 sm:$0xff]  }
 0x6e4   :  { %v3407_v18 = vld [vmem:[#allocation10 + $0x4] ss:$8 sps:$4 sm:$0xff]   ;;  %v3411_v7 = vld [vmem:[#allocation10] ss:$8 sps:$4 sm:$0xff]  }
 0x6ed   :  { %v2628_v11 = vpop.eup %2627 }
 0x6ee   :  { %v1187_v12 = vpack.c.bf16 %v2628_v11, %v2628_v11  ;;  %v3420_v11 = vld [vmem:[%s3609_s3] ss:$0 sm:$0xff]  ;;  %s2790_s3 = smov [#allocation12]  }
 0x6ef   :  { %s1968_s22 = sshll.u32 %s2790_s3, 4  ;;  %s1969_s22 = int_to_ptr.vmem [resolvable:$true] %s1968_s22 }
 0x6f0   :  { %1221 = vmatmul.mubr.bf16.vlgmr.msra.gmra.mxu0 %v1187_v12  ;;  %2407 = vmatmul.mubr.bf16.vlgmr.msra.gmra.mxu1 %v1187_v12  ;;  %v295_v12 = vadd.f32 %v3420_v11, %v2996_v60  ;;  %v298_v60 = vadd.f32 %v3420_v11, %v3000_v62  ;;  %v303_v62 = vadd.f32 %v3420_v11, %v3006_v5  ;;  %s2750_s23 = scalar_lea.vmem %s1969_s22, 4096  ;;  %p2755_p7 = scmp.lt.s32.totalorder %s1969_s22, %s1969_s22 }
 0x6f1   :  { %1280 = vmatpush1.bf16.msra.mxu0 %v2876_v20  ;;  %2411 = vmatpush3.bf16.msra.mxu1 %v3218_v56  ;;  %v3278_v20 = vld [vmem:[#allocation9 + $0x20] sm:$0xff]   ;;  %v306_v5 = vadd.f32 %v3420_v11, %v3013_v16  ;;  %v311_v16 = vadd.f32 %v3420_v11, %v3004_v1  ;;  %p2751_p6 = scmp.ne.s32.totalorder %s1969_s22, %s2750_s23  ;;  %p2756_p8 = scmp.lt.s32.totalorder %s2750_s23, %s2750_s23 }
 0x6f2   :  { %1281 = vmatprep.subr.bf16.mxu0 %v2880_v21  ;;  %2412 = vmatprep.subr.bf16.mxu1 %v2786_v0  ;;  %v3284_v21 = vld [vmem:[#allocation9 + $0x18] sm:$0xff]  }
 0x6f3   :  { %1311 = vmatprep.mubr.bf16.mxu0 %v2789_v42  ;;  %2426 = vmatprep.mubr.msk.bf16.mxu1 %vm2787_vm0, %v2786_v0  ;;  %p2757_p9 = por %p2756_p8, %p2755_p7 }
 0x6f5   :  { %1282 = vmatpush1.bf16.msra.mxu0 %v2884_v24  ;;  %2413 = vmatpush3.bf16.msra.mxu1 %v3227_v57  ;;  %v3290_v24 = vld [vmem:[#allocation9 + $0x10] sm:$0xff]   ;;  %p2758_p10 = pnand %p2757_p9, %p2751_p6 }
 0x6f6   :  { %1283 = vmatprep.subr.bf16.mxu0 %v2905_v26  ;;  %2414 = vmatprep.subr.bf16.mxu1 %v2786_v0 }
 0x6f9   :  { %1284 = vmatpush1.bf16.msra.mxu0 %v2907_v27  ;;  %2415 = vmatpush3.bf16.msra.mxu1 %v3233_v50 }
 0x6fa   :  { %1285 = vmatprep.subr.bf16.mxu0 %v2911_v28  ;;  %2416 = vmatprep.subr.bf16.mxu1 %v2786_v0 }
 0x6fd   :  { %1286 = vmatpush1.bf16.msra.mxu0 %v2913_v29  ;;  %2417 = vmatpush3.bf16.msra.mxu1 %v3278_v20 }
 0x6fe   :  { %1287 = vmatprep.subr.bf16.mxu0 %v2917_v32  ;;  %2418 = vmatprep.subr.bf16.mxu1 %v2786_v0 }
 0x701   :  { %1288 = vmatpush1.bf16.msra.mxu0 %v2919_v33  ;;  %2419 = vmatpush3.bf16.msra.mxu1 %v3284_v21 }
 0x702   :  { %1289 = vmatprep.subr.bf16.mxu0 %v2923_v34  ;;  %2420 = vmatprep.subr.bf16.mxu1 %v2786_v0 }
 0x705   :  { %1290 = vmatpush1.bf16.msra.mxu0 %v2925_v35  ;;  %2421 = vmatpush3.bf16.msra.mxu1 %v3290_v24 }
 0x706   :  { %1291 = vmatprep.subr.bf16.mxu0 %v2929_v38  ;;  %2422 = vmatprep.subr.bf16.mxu1 %v2786_v0 }
 0x709   :  { %1292 = vmatpush1.bf16.msra.mxu0 %v2931_v39  ;;  %2423 = vmatpush3.bf16.msra.mxu1 %v3296_v58 }
 0x70a   :  { %1293 = vmatprep.subr.bf16.mxu0 %v2935_v40  ;;  %2424 = vmatprep.subr.bf16.mxu1 %v2786_v0 }
 0x70d   :  { %1294 = vmatpush1.bf16.msra.mxu0 %v2937_v41  ;;  %2425 = vmatpush3.bf16.msra.mxu1 %v3302_v54 }
 0x70e   :  { %1370 = vmatprep.subr.bf16.mxu0 %v3305_v14  ;;  %2430 = vmatprep.subr.bf16.mxu1 %v2786_v0 }
 0x7b0   :  { %v1222_v25 = vpop.f32.mrf.mxu0  ;;  %v1270_v2 = vpop.f32.mrf.mxu1 }
 0x7b1   :  { %v1223_v4 = vadd.f32 %v1222_v25, %v3015_v19  ;;  %v1276_v6 = vadd.f32 %v1270_v2, %v287_v22 }
 0x7b2   :  { %v1224_v59 = vpop.f32.mrf.mxu0  ;;  %v2408_v30 = vpop.f32.mrf.mxu1 }
 0x7b3   :  { %1232 = vst [vmem:[#allocation12 + $0x70] sm:$0xff] %v1223_v4  ;;  %2629 = vtanh.f32 %v1276_v6  ;;  %v1225_v31 = vadd.f32 %v1224_v59, %v3018_v23 }
 0x7b4   :  { %v1226_v36 = vpop.f32.mrf.mxu0  ;;  %v1273_v37 = vpop.f32.mrf.mxu1 }
 0x7b5   :  { %1233 = vst [vmem:[#allocation12 + $0x78] sm:$0xff] %v1225_v31 }
 0x7b6   :  { %v1227_v43 = vpop.f32.mrf.mxu0  ;;  %v2409_v44 = vpop.f32.mrf.mxu1 }
 0x7c0   :  { %v2630_v46 = vpop.eup %2629 }
 0x7c1   :  { %v1278_v47 = vpack.c.bf16 %v2630_v46, %v2630_v46 }
 0x7c3   :  { %1312 = vmatmul.mubr.bf16.vlgmr.msra.gmra.mxu0 %v1278_v47  ;;  %2427 = vmatmul.mubr.bf16.vlgmr.msra.gmra.mxu1 %v1278_v47 }
 0x7c4   :  { %1371 = vmatpush1.bf16.msra.mxu0 %v3313_v61  ;;  %2431 = vmatpush3.bf16.msra.mxu1 %v3218_v56 }
 0x7c5   :  { %1372 = vmatprep.subr.bf16.mxu0 %v3317_v48  ;;  %2432 = vmatprep.subr.bf16.mxu1 %v2786_v0 }
 0x7c6   :  { %1402 = vmatprep.mubr.bf16.mxu0 %v2789_v42  ;;  %2446 = vmatprep.mubr.msk.bf16.mxu1 %vm2787_vm0, %v2786_v0 }
 0x7c8   :  { %1373 = vmatpush1.bf16.msra.mxu0 %v3324_v49  ;;  %2433 = vmatpush3.bf16.msra.mxu1 %v3227_v57 }
 0x7c9   :  { %1374 = vmatprep.subr.bf16.mxu0 %v2905_v26  ;;  %2434 = vmatprep.subr.bf16.mxu1 %v2786_v0  ;;  %v290_v26 = vadd.f32 %v2948_v45, %v3002_v63  ;;  %v3367_v45 = vld [vmem:[#allocation10 + $0x54] ss:$8 sps:$4 sm:$0xff]   ;;  %v3371_v63 = vld [vmem:[#allocation10 + $0x50] ss:$8 sps:$4 sm:$0xff]  }
 0x7cc   :  { %1375 = vmatpush1.bf16.msra.mxu0 %v2907_v27  ;;  %2435 = vmatpush3.bf16.msra.mxu1 %v3233_v50 }
 0x7cd   :  { %1376 = vmatprep.subr.bf16.mxu0 %v2911_v28  ;;  %2436 = vmatprep.subr.bf16.mxu1 %v2786_v0 }
 0x7d0   :  { %1377 = vmatpush1.bf16.msra.mxu0 %v2913_v29  ;;  %2437 = vmatpush3.bf16.msra.mxu1 %v3278_v20 }
 0x7d1   :  { %1378 = vmatprep.subr.bf16.mxu0 %v2917_v32  ;;  %2438 = vmatprep.subr.bf16.mxu1 %v2786_v0 }
 0x7d4   :  { %1379 = vmatpush1.bf16.msra.mxu0 %v2919_v33  ;;  %2439 = vmatpush3.bf16.msra.mxu1 %v3284_v21 }
 0x7d5   :  { %1380 = vmatprep.subr.bf16.mxu0 %v2923_v34  ;;  %2440 = vmatprep.subr.bf16.mxu1 %v2786_v0 }
 0x7d8   :  { %1381 = vmatpush1.bf16.msra.mxu0 %v2925_v35  ;;  %2441 = vmatpush3.bf16.msra.mxu1 %v3290_v24 }
 0x7d9   :  { %1382 = vmatprep.subr.bf16.mxu0 %v2929_v38  ;;  %2442 = vmatprep.subr.bf16.mxu1 %v2786_v0 }
 0x7dc   :  { %1383 = vmatpush1.bf16.msra.mxu0 %v2931_v39  ;;  %2443 = vmatpush3.bf16.msra.mxu1 %v3296_v58 }
 0x7dd   :  { %1384 = vmatprep.subr.bf16.mxu0 %v2935_v40  ;;  %2444 = vmatprep.subr.bf16.mxu1 %v2786_v0 }
 0x7e0   :  { %1385 = vmatpush1.bf16.msra.mxu0 %v2937_v41  ;;  %2445 = vmatpush3.bf16.msra.mxu1 %v3302_v54 }
 0x7e1   :  { %1461 = vmatprep.subr.bf16.mxu0 %v3305_v14  ;;  %2450 = vmatprep.subr.bf16.mxu1 %v2786_v0 }
 0x883   :  { %v1313_v27 = vpop.f32.mrf.mxu0  ;;  %v1361_v28 = vpop.f32.mrf.mxu1 }
 0x884   :  { %v1314_v29 = vadd.f32 %v1313_v27, %v3015_v19  ;;  %v1367_v32 = vadd.f32 %v1361_v28, %v290_v26 }
 0x885   :  { %v1315_v33 = vpop.f32.mrf.mxu0  ;;  %v2428_v34 = vpop.f32.mrf.mxu1 }
 0x886   :  { %1323 = vst [vmem:[#allocation12 + $0x80] sm:$0xff] %v1314_v29  ;;  %2631 = vtanh.f32 %v1367_v32  ;;  %v1316_v35 = vadd.f32 %v1315_v33, %v3018_v23 }
 0x887   :  { %v1317_v38 = vpop.f32.mrf.mxu0  ;;  %v1364_v39 = vpop.f32.mrf.mxu1 }
 0x888   :  { %1324 = vst [vmem:[#allocation12 + $0x88] sm:$0xff] %v1316_v35 }
 0x889   :  { %v1318_v40 = vpop.f32.mrf.mxu0  ;;  %v2429_v41 = vpop.f32.mrf.mxu1 }
 0x893   :  { %v2632_v8 = vpop.eup %2631 }
 0x894   :  { %v1369_v10 = vpack.c.bf16 %v2632_v8, %v2632_v8 }
 0x896   :  { %1403 = vmatmul.mubr.bf16.vlgmr.msra.gmra.mxu0 %v1369_v10  ;;  %2447 = vmatmul.mubr.bf16.vlgmr.msra.gmra.mxu1 %v1369_v10 }
 0x897   :  { %1462 = vmatpush1.bf16.msra.mxu0 %v3313_v61  ;;  %2451 = vmatpush3.bf16.msra.mxu1 %v3218_v56 }
 0x898   :  { %1463 = vmatprep.subr.bf16.mxu0 %v3317_v48  ;;  %2452 = vmatprep.subr.bf16.mxu1 %v2786_v0 }
 0x899   :  { %1493 = vmatprep.mubr.bf16.mxu0 %v2789_v42  ;;  %2466 = vmatprep.mubr.msk.bf16.mxu1 %vm2787_vm0, %v2786_v0 }
 0x89b   :  { %1464 = vmatpush1.bf16.msra.mxu0 %v3324_v49  ;;  %2453 = vmatpush3.bf16.msra.mxu1 %v3227_v57 }
 0x89c   :  { %1465 = vmatprep.subr.bf16.mxu0 %v3367_v45  ;;  %2454 = vmatprep.subr.bf16.mxu1 %v2786_v0 }
 0x89f   :  { %1466 = vmatpush1.bf16.msra.mxu0 %v3371_v63  ;;  %2455 = vmatpush3.bf16.msra.mxu1 %v3233_v50 }
 0x8a0   :  { %1467 = vmatprep.subr.bf16.mxu0 %v3375_v13  ;;  %2456 = vmatprep.subr.bf16.mxu1 %v2786_v0 }
 0x8a3   :  { %1468 = vmatpush1.bf16.msra.mxu0 %v3379_v51  ;;  %2457 = vmatpush3.bf16.msra.mxu1 %v3278_v20 }
 0x8a4   :  { %1469 = vmatprep.subr.bf16.mxu0 %v3383_v15  ;;  %2458 = vmatprep.subr.bf16.mxu1 %v2786_v0 }
 0x8a7   :  { %1470 = vmatpush1.bf16.msra.mxu0 %v3387_v52  ;;  %2459 = vmatpush3.bf16.msra.mxu1 %v3284_v21 }
 0x8a8   :  { %1471 = vmatprep.subr.bf16.mxu0 %v3391_v53  ;;  %2460 = vmatprep.subr.bf16.mxu1 %v2786_v0 }
 0x8ab   :  { %1472 = vmatpush1.bf16.msra.mxu0 %v3395_v55  ;;  %2461 = vmatpush3.bf16.msra.mxu1 %v3290_v24 }
 0x8ac   :  { %1473 = vmatprep.subr.bf16.mxu0 %v3399_v3  ;;  %2462 = vmatprep.subr.bf16.mxu1 %v2786_v0 }
 0x8af   :  { %1474 = vmatpush1.bf16.msra.mxu0 %v3403_v17  ;;  %2463 = vmatpush3.bf16.msra.mxu1 %v3296_v58 }
 0x8b0   :  { %1475 = vmatprep.subr.bf16.mxu0 %v3407_v18  ;;  %2464 = vmatprep.subr.bf16.mxu1 %v2786_v0 }
 0x8b3   :  { %1476 = vmatpush1.bf16.msra.mxu0 %v3411_v7  ;;  %2465 = vmatpush3.bf16.msra.mxu1 %v3302_v54 }
 0x8b4   :  { %1552 = vmatprep.subr.bf16.mxu0 %v3305_v14  ;;  %2470 = vmatprep.subr.bf16.mxu1 %v2786_v0 }
 0x956   :  { %v1404_v22 = vpop.f32.mrf.mxu0  ;;  %v1452_v25 = vpop.f32.mrf.mxu1 }
 0x957   :  { %v1405_v2 = vadd.f32 %v1404_v22, %v3015_v19  ;;  %v1458_v4 = vadd.f32 %v1452_v25, %v295_v12 }
 0x958   :  { %v1406_v6 = vpop.f32.mrf.mxu0  ;;  %v2448_v59 = vpop.f32.mrf.mxu1 }
 0x959   :  { %1414 = vst [vmem:[#allocation12 + $0x90] sm:$0xff] %v1405_v2  ;;  %2633 = vtanh.f32 %v1458_v4  ;;  %v1407_v30 = vadd.f32 %v1406_v6, %v3018_v23 }
 0x95a   :  { %v1408_v31 = vpop.f32.mrf.mxu0  ;;  %v1455_v36 = vpop.f32.mrf.mxu1 }
 0x95b   :  { %1415 = vst [vmem:[#allocation12 + $0x98] sm:$0xff] %v1407_v30 }
 0x95c   :  { %v1409_v37 = vpop.f32.mrf.mxu0  ;;  %v2449_v43 = vpop.f32.mrf.mxu1 }
 0x966   :  { %v2634_v44 = vpop.eup %2633 }
 0x967   :  { %v1460_v46 = vpack.c.bf16 %v2634_v44, %v2634_v44 }
 0x969   :  { %1494 = vmatmul.mubr.bf16.vlgmr.msra.gmra.mxu0 %v1460_v46  ;;  %2467 = vmatmul.mubr.bf16.vlgmr.msra.gmra.mxu1 %v1460_v46 }
 0x96a   :  { %1553 = vmatpush1.bf16.msra.mxu0 %v3313_v61  ;;  %2471 = vmatpush3.bf16.msra.mxu1 %v3218_v56 }
 0x96b   :  { %1554 = vmatprep.subr.bf16.mxu0 %v3317_v48  ;;  %2472 = vmatprep.subr.bf16.mxu1 %v2786_v0 }
 0x96c   :  { %1584 = vmatprep.mubr.bf16.mxu0 %v2789_v42  ;;  %2486 = vmatprep.mubr.msk.bf16.mxu1 %vm2787_vm0, %v2786_v0 }
 0x96e   :  { %1555 = vmatpush1.bf16.msra.mxu0 %v3324_v49  ;;  %2473 = vmatpush3.bf16.msra.mxu1 %v3227_v57 }
 0x96f   :  { %1556 = vmatprep.subr.bf16.mxu0 %v3367_v45  ;;  %2474 = vmatprep.subr.bf16.mxu1 %v2786_v0 }
 0x972   :  { %1557 = vmatpush1.bf16.msra.mxu0 %v3371_v63  ;;  %2475 = vmatpush3.bf16.msra.mxu1 %v3233_v50 }
 0x973   :  { %1558 = vmatprep.subr.bf16.mxu0 %v3375_v13  ;;  %2476 = vmatprep.subr.bf16.mxu1 %v2786_v0 }
 0x976   :  { %1559 = vmatpush1.bf16.msra.mxu0 %v3379_v51  ;;  %2477 = vmatpush3.bf16.msra.mxu1 %v3278_v20 }
 0x977   :  { %1560 = vmatprep.subr.bf16.mxu0 %v3383_v15  ;;  %2478 = vmatprep.subr.bf16.mxu1 %v2786_v0 }
 0x97a   :  { %1561 = vmatpush1.bf16.msra.mxu0 %v3387_v52  ;;  %2479 = vmatpush3.bf16.msra.mxu1 %v3284_v21 }
 0x97b   :  { %1562 = vmatprep.subr.bf16.mxu0 %v3391_v53  ;;  %2480 = vmatprep.subr.bf16.mxu1 %v2786_v0 }
 0x97e   :  { %1563 = vmatpush1.bf16.msra.mxu0 %v3395_v55  ;;  %2481 = vmatpush3.bf16.msra.mxu1 %v3290_v24 }
 0x97f   :  { %1564 = vmatprep.subr.bf16.mxu0 %v3399_v3  ;;  %2482 = vmatprep.subr.bf16.mxu1 %v2786_v0 }
 0x982   :  { %1565 = vmatpush1.bf16.msra.mxu0 %v3403_v17  ;;  %2483 = vmatpush3.bf16.msra.mxu1 %v3296_v58 }
 0x983   :  { %1566 = vmatprep.subr.bf16.mxu0 %v3407_v18  ;;  %2484 = vmatprep.subr.bf16.mxu1 %v2786_v0 }
 0x986   :  { %1567 = vmatpush1.bf16.msra.mxu0 %v3411_v7  ;;  %2485 = vmatpush3.bf16.msra.mxu1 %v3302_v54 }
 0x987   :  { %1643 = vmatprep.subr.bf16.mxu0 %v3305_v14  ;;  %2490 = vmatprep.subr.bf16.mxu1 %v2786_v0 }
 0xa29   :  { %v1495_v47 = vpop.f32.mrf.mxu0  ;;  %v1543_v26 = vpop.f32.mrf.mxu1 }
 0xa2a   :  { %v1496_v27 = vadd.f32 %v1495_v47, %v3015_v19  ;;  %v1549_v28 = vadd.f32 %v1543_v26, %v298_v60 }
 0xa2b   :  { %v1497_v29 = vpop.f32.mrf.mxu0  ;;  %v2468_v32 = vpop.f32.mrf.mxu1 }
 0xa2c   :  { %1505 = vst [vmem:[#allocation12 + $0xa0] sm:$0xff] %v1496_v27  ;;  %2635 = vtanh.f32 %v1549_v28  ;;  %v1498_v33 = vadd.f32 %v1497_v29, %v3018_v23 }
 0xa2d   :  { %v1499_v34 = vpop.f32.mrf.mxu0  ;;  %v1546_v35 = vpop.f32.mrf.mxu1 }
 0xa2e   :  { %1506 = vst [vmem:[#allocation12 + $0xa8] sm:$0xff] %v1498_v33 }
 0xa2f   :  { %v1500_v38 = vpop.f32.mrf.mxu0  ;;  %v2469_v39 = vpop.f32.mrf.mxu1 }
 0xa39   :  { %v2636_v40 = vpop.eup %2635 }
 0xa3a   :  { %v1551_v41 = vpack.c.bf16 %v2636_v40, %v2636_v40 }
 0xa3c   :  { %1585 = vmatmul.mubr.bf16.vlgmr.msra.gmra.mxu0 %v1551_v41  ;;  %2487 = vmatmul.mubr.bf16.vlgmr.msra.gmra.mxu1 %v1551_v41 }
 0xa3d   :  { %1644 = vmatpush1.bf16.msra.mxu0 %v3313_v61  ;;  %2491 = vmatpush3.bf16.msra.mxu1 %v3218_v56 }
 0xa3e   :  { %1645 = vmatprep.subr.bf16.mxu0 %v3317_v48  ;;  %2492 = vmatprep.subr.bf16.mxu1 %v2786_v0 }
 0xa3f   :  { %1675 = vmatprep.mubr.bf16.mxu0 %v2789_v42  ;;  %2506 = vmatprep.mubr.msk.bf16.mxu1 %vm2787_vm0, %v2786_v0 }
 0xa41   :  { %1646 = vmatpush1.bf16.msra.mxu0 %v3324_v49  ;;  %2493 = vmatpush3.bf16.msra.mxu1 %v3227_v57 }
 0xa42   :  { %1647 = vmatprep.subr.bf16.mxu0 %v3367_v45  ;;  %2494 = vmatprep.subr.bf16.mxu1 %v2786_v0 }
 0xa45   :  { %1648 = vmatpush1.bf16.msra.mxu0 %v3371_v63  ;;  %2495 = vmatpush3.bf16.msra.mxu1 %v3233_v50 }
 0xa46   :  { %1649 = vmatprep.subr.bf16.mxu0 %v3375_v13  ;;  %2496 = vmatprep.subr.bf16.mxu1 %v2786_v0 }
 0xa49   :  { %1650 = vmatpush1.bf16.msra.mxu0 %v3379_v51  ;;  %2497 = vmatpush3.bf16.msra.mxu1 %v3278_v20 }
 0xa4a   :  { %1651 = vmatprep.subr.bf16.mxu0 %v3383_v15  ;;  %2498 = vmatprep.subr.bf16.mxu1 %v2786_v0 }
 0xa4d   :  { %1652 = vmatpush1.bf16.msra.mxu0 %v3387_v52  ;;  %2499 = vmatpush3.bf16.msra.mxu1 %v3284_v21 }
 0xa4e   :  { %1653 = vmatprep.subr.bf16.mxu0 %v3391_v53  ;;  %2500 = vmatprep.subr.bf16.mxu1 %v2786_v0 }
 0xa51   :  { %1654 = vmatpush1.bf16.msra.mxu0 %v3395_v55  ;;  %2501 = vmatpush3.bf16.msra.mxu1 %v3290_v24 }
 0xa52   :  { %1655 = vmatprep.subr.bf16.mxu0 %v3399_v3  ;;  %2502 = vmatprep.subr.bf16.mxu1 %v2786_v0 }
 0xa55   :  { %1656 = vmatpush1.bf16.msra.mxu0 %v3403_v17  ;;  %2503 = vmatpush3.bf16.msra.mxu1 %v3296_v58 }
 0xa56   :  { %1657 = vmatprep.subr.bf16.mxu0 %v3407_v18  ;;  %2504 = vmatprep.subr.bf16.mxu1 %v2786_v0 }
 0xa59   :  { %1658 = vmatpush1.bf16.msra.mxu0 %v3411_v7  ;;  %2505 = vmatpush3.bf16.msra.mxu1 %v3302_v54 }
 0xa5a   :  { %1734 = vmatprep.subr.bf16.mxu0 %v3305_v14  ;;  %2510 = vmatprep.subr.bf16.mxu1 %v2786_v0 }
 0xafc   :  { %v1586_v8 = vpop.f32.mrf.mxu0  ;;  %v1634_v10 = vpop.f32.mrf.mxu1 }
 0xafd   :  { %v1587_v12 = vadd.f32 %v1586_v8, %v3015_v19  ;;  %v1640_v22 = vadd.f32 %v1634_v10, %v303_v62 }
 0xafe   :  { %v1588_v25 = vpop.f32.mrf.mxu0  ;;  %v2488_v2 = vpop.f32.mrf.mxu1 }
 0xaff   :  { %1596 = vst [vmem:[#allocation12 + $0xb0] sm:$0xff] %v1587_v12  ;;  %2637 = vtanh.f32 %v1640_v22  ;;  %v1589_v4 = vadd.f32 %v1588_v25, %v3018_v23 }
 0xb00   :  { %v1590_v6 = vpop.f32.mrf.mxu0  ;;  %v1637_v59 = vpop.f32.mrf.mxu1 }
 0xb01   :  { %1597 = vst [vmem:[#allocation12 + $0xb8] sm:$0xff] %v1589_v4 }
 0xb02   :  { %v1591_v30 = vpop.f32.mrf.mxu0  ;;  %v2489_v31 = vpop.f32.mrf.mxu1 }
 0xb0c   :  { %v2638_v36 = vpop.eup %2637 }
 0xb0d   :  { %v1642_v37 = vpack.c.bf16 %v2638_v36, %v2638_v36 }
 0xb0f   :  { %1676 = vmatmul.mubr.bf16.vlgmr.msra.gmra.mxu0 %v1642_v37  ;;  %2507 = vmatmul.mubr.bf16.vlgmr.msra.gmra.mxu1 %v1642_v37 }
 0xb10   :  { %1735 = vmatpush1.bf16.msra.mxu0 %v3313_v61  ;;  %2511 = vmatpush3.bf16.msra.mxu1 %v3218_v56 }
 0xb11   :  { %1736 = vmatprep.subr.bf16.mxu0 %v3317_v48  ;;  %2512 = vmatprep.subr.bf16.mxu1 %v2786_v0 }
 0xb12   :  { %1766 = vmatprep.mubr.bf16.mxu0 %v2789_v42  ;;  %2526 = vmatprep.mubr.msk.bf16.mxu1 %vm2787_vm0, %v2786_v0 }
 0xb14   :  { %1737 = vmatpush1.bf16.msra.mxu0 %v3324_v49  ;;  %2513 = vmatpush3.bf16.msra.mxu1 %v3227_v57 }
 0xb15   :  { %1738 = vmatprep.subr.bf16.mxu0 %v3367_v45  ;;  %2514 = vmatprep.subr.bf16.mxu1 %v2786_v0 }
 0xb18   :  { %1739 = vmatpush1.bf16.msra.mxu0 %v3371_v63  ;;  %2515 = vmatpush3.bf16.msra.mxu1 %v3233_v50 }
 0xb19   :  { %1740 = vmatprep.subr.bf16.mxu0 %v3375_v13  ;;  %2516 = vmatprep.subr.bf16.mxu1 %v2786_v0 }
 0xb1c   :  { %1741 = vmatpush1.bf16.msra.mxu0 %v3379_v51  ;;  %2517 = vmatpush3.bf16.msra.mxu1 %v3278_v20 }
 0xb1d   :  { %1742 = vmatprep.subr.bf16.mxu0 %v3383_v15  ;;  %2518 = vmatprep.subr.bf16.mxu1 %v2786_v0 }
 0xb20   :  { %1743 = vmatpush1.bf16.msra.mxu0 %v3387_v52  ;;  %2519 = vmatpush3.bf16.msra.mxu1 %v3284_v21 }
 0xb21   :  { %1744 = vmatprep.subr.bf16.mxu0 %v3391_v53  ;;  %2520 = vmatprep.subr.bf16.mxu1 %v2786_v0 }
 0xb24   :  { %1745 = vmatpush1.bf16.msra.mxu0 %v3395_v55  ;;  %2521 = vmatpush3.bf16.msra.mxu1 %v3290_v24 }
 0xb25   :  { %1746 = vmatprep.subr.bf16.mxu0 %v3399_v3  ;;  %2522 = vmatprep.subr.bf16.mxu1 %v2786_v0 }
 0xb28   :  { %1747 = vmatpush1.bf16.msra.mxu0 %v3403_v17  ;;  %2523 = vmatpush3.bf16.msra.mxu1 %v3296_v58 }
 0xb29   :  { %1748 = vmatprep.subr.bf16.mxu0 %v3407_v18  ;;  %2524 = vmatprep.subr.bf16.mxu1 %v2786_v0 }
 0xb2c   :  { %1749 = vmatpush1.bf16.msra.mxu0 %v3411_v7  ;;  %2525 = vmatpush3.bf16.msra.mxu1 %v3302_v54 }
 0xb2d   :  { %1825 = vmatprep.subr.bf16.mxu0 %v3305_v14  ;;  %2530 = vmatprep.subr.bf16.mxu1 %v2786_v0 }
 0xbcf   :  { %v1677_v43 = vpop.f32.mrf.mxu0  ;;  %v1725_v44 = vpop.f32.mrf.mxu1 }
 0xbd0   :  { %v1678_v46 = vadd.f32 %v1677_v43, %v3015_v19  ;;  %v1731_v60 = vadd.f32 %v1725_v44, %v306_v5 }
 0xbd1   :  { %v1679_v47 = vpop.f32.mrf.mxu0  ;;  %v2508_v26 = vpop.f32.mrf.mxu1 }
 0xbd2   :  { %1687 = vst [vmem:[#allocation12 + $0xc0] sm:$0xff] %v1678_v46  ;;  %2639 = vtanh.f32 %v1731_v60  ;;  %v1680_v27 = vadd.f32 %v1679_v47, %v3018_v23 }
 0xbd3   :  { %v1681_v28 = vpop.f32.mrf.mxu0  ;;  %v1728_v29 = vpop.f32.mrf.mxu1 }
 0xbd4   :  { %1688 = vst [vmem:[#allocation12 + $0xc8] sm:$0xff] %v1680_v27 }
 0xbd5   :  { %v1682_v32 = vpop.f32.mrf.mxu0  ;;  %v2509_v33 = vpop.f32.mrf.mxu1 }
 0xbdf   :  { %v2640_v34 = vpop.eup %2639 }
 0xbe0   :  { %v1733_v35 = vpack.c.bf16 %v2640_v34, %v2640_v34 }
 0xbe2   :  { %1767 = vmatmul.mubr.bf16.vlgmr.msra.gmra.mxu0 %v1733_v35  ;;  %2527 = vmatmul.mubr.bf16.vlgmr.msra.gmra.mxu1 %v1733_v35 }
 0xbe3   :  { %1826 = vmatpush1.bf16.msra.mxu0 %v3313_v61  ;;  %2531 = vmatpush3.bf16.msra.mxu1 %v3218_v56 }
 0xbe4   :  { %1827 = vmatprep.subr.bf16.mxu0 %v3317_v48  ;;  %2532 = vmatprep.subr.bf16.mxu1 %v2786_v0 }
 0xbe5   :  { %1857 = vmatprep.mubr.bf16.mxu0 %v2789_v42  ;;  %2546 = vmatprep.mubr.msk.bf16.mxu1 %vm2787_vm0, %v2786_v0 }
 0xbe7   :  { %1828 = vmatpush1.bf16.msra.mxu0 %v3324_v49  ;;  %2533 = vmatpush3.bf16.msra.mxu1 %v3227_v57 }
 0xbe8   :  { %1829 = vmatprep.subr.bf16.mxu0 %v3367_v45  ;;  %2534 = vmatprep.subr.bf16.mxu1 %v2786_v0 }
 0xbeb   :  { %1830 = vmatpush1.bf16.msra.mxu0 %v3371_v63  ;;  %2535 = vmatpush3.bf16.msra.mxu1 %v3233_v50 }
 0xbec   :  { %1831 = vmatprep.subr.bf16.mxu0 %v3375_v13  ;;  %2536 = vmatprep.subr.bf16.mxu1 %v2786_v0 }
 0xbef   :  { %1832 = vmatpush1.bf16.msra.mxu0 %v3379_v51  ;;  %2537 = vmatpush3.bf16.msra.mxu1 %v3278_v20 }
 0xbf0   :  { %1833 = vmatprep.subr.bf16.mxu0 %v3383_v15  ;;  %2538 = vmatprep.subr.bf16.mxu1 %v2786_v0 }
 0xbf3   :  { %1834 = vmatpush1.bf16.msra.mxu0 %v3387_v52  ;;  %2539 = vmatpush3.bf16.msra.mxu1 %v3284_v21 }
 0xbf4   :  { %1835 = vmatprep.subr.bf16.mxu0 %v3391_v53  ;;  %2540 = vmatprep.subr.bf16.mxu1 %v2786_v0 }
 0xbf7   :  { %1836 = vmatpush1.bf16.msra.mxu0 %v3395_v55  ;;  %2541 = vmatpush3.bf16.msra.mxu1 %v3290_v24 }
 0xbf8   :  { %1837 = vmatprep.subr.bf16.mxu0 %v3399_v3  ;;  %2542 = vmatprep.subr.bf16.mxu1 %v2786_v0 }
 0xbfb   :  { %1838 = vmatpush1.bf16.msra.mxu0 %v3403_v17  ;;  %2543 = vmatpush3.bf16.msra.mxu1 %v3296_v58 }
 0xbfc   :  { %1839 = vmatprep.subr.bf16.mxu0 %v3407_v18  ;;  %2544 = vmatprep.subr.bf16.mxu1 %v2786_v0 }
 0xbff   :  { %1840 = vmatpush1.bf16.msra.mxu0 %v3411_v7  ;;  %2545 = vmatpush3.bf16.msra.mxu1 %v3302_v54 }
 0xc00   :  { %1916 = vmatprep.subr.bf16.mxu0 %v3305_v14 }
 0xca2   :  { %v1768_v56 = vpop.f32.mrf.mxu0  ;;  %v1816_v57 = vpop.f32.mrf.mxu1 }
 0xca3   :  { %v1769_v50 = vadd.f32 %v1768_v56, %v3015_v19  ;;  %v1822_v20 = vadd.f32 %v1816_v57, %v311_v16 }
 0xca4   :  { %v1770_v21 = vpop.f32.mrf.mxu0  ;;  %v2528_v24 = vpop.f32.mrf.mxu1 }
 0xca5   :  { %1778 = vst [vmem:[#allocation12 + $0xd0] sm:$0xff] %v1769_v50  ;;  %2641 = vtanh.f32 %v1822_v20  ;;  %v1771_v0 = vadd.f32 %v1770_v21, %v3018_v23 }
 0xca6   :  { %v1772_v58 = vpop.f32.mrf.mxu0  ;;  %v1819_v38 = vpop.f32.mrf.mxu1 }
 0xca7   :  { %1779 = vst [vmem:[#allocation12 + $0xd8] sm:$0xff] %v1771_v0 }
 0xca8   :  { %v1773_v54 = vpop.f32.mrf.mxu0  ;;  %v2529_v39 = vpop.f32.mrf.mxu1 }
 0xcb2   :  { %v2642_v14 = vpop.eup %2641 }
 0xcb3   :  { %v1824_v40 = vpack.c.bf16 %v2642_v14, %v2642_v14 }
 0xcb5   :  { %1858 = vmatmul.mubr.bf16.vlgmr.msra.gmra.mxu0 %v1824_v40  ;;  %2547 = vmatmul.mubr.bf16.vlgmr.msra.gmra.mxu1 %v1824_v40 }
 0xcb6   :  { %1917 = vmatpush1.bf16.msra.mxu0 %v3313_v61  ;;  %1948 = vmatprep.mubr.bf16.mxu0 %v2789_v42  ;;  %v314_v42 = vadd.f32 %v3420_v11, %v3008_v9 }
 0xcb7   :  { %1918 = vmatprep.subr.bf16.mxu0 %v3317_v48 }
 0xcba   :  { %1919 = vmatpush1.bf16.msra.mxu0 %v3324_v49 }
 0xcbb   :  { %1920 = vmatprep.subr.bf16.mxu0 %v3367_v45 }
 0xcbe   :  { %1921 = vmatpush1.bf16.msra.mxu0 %v3371_v63 }
 0xcbf   :  { %1922 = vmatprep.subr.bf16.mxu0 %v3375_v13 }
 0xcc2   :  { %1923 = vmatpush1.bf16.msra.mxu0 %v3379_v51 }
 0xcc3   :  { %1924 = vmatprep.subr.bf16.mxu0 %v3383_v15 }
 0xcc6   :  { %1925 = vmatpush1.bf16.msra.mxu0 %v3387_v52 }
 0xcc7   :  { %1926 = vmatprep.subr.bf16.mxu0 %v3391_v53 }
 0xcca   :  { %1927 = vmatpush1.bf16.msra.mxu0 %v3395_v55 }
 0xccb   :  { %1928 = vmatprep.subr.bf16.mxu0 %v3399_v3 }
 0xcce   :  { %1929 = vmatpush1.bf16.msra.mxu0 %v3403_v17 }
 0xccf   :  { %1930 = vmatprep.subr.bf16.mxu0 %v3407_v18 }
 0xcd2   :  { %1931 = vmatpush1.bf16.msra.mxu0 %v3411_v7 }
 0xd75   :  { %v1859_v1 = vpop.f32.mrf.mxu0  ;;  %v1907_v61 = vpop.f32.mrf.mxu1 }
 0xd76   :  { %v1860_v48 = vadd.f32 %v1859_v1, %v3015_v19  ;;  %v1913_v49 = vadd.f32 %v1907_v61, %v314_v42 }
 0xd77   :  { %v1861_v45 = vpop.f32.mrf.mxu0  ;;  %v2548_v63 = vpop.f32.mrf.mxu1 }
 0xd78   :  { %1869 = vst [vmem:[#allocation12 + $0xe0] sm:$0xff] %v1860_v48  ;;  %2643 = vtanh.f32 %v1913_v49  ;;  %v1862_v13 = vadd.f32 %v1861_v45, %v3018_v23 }
 0xd79   :  { %v1863_v51 = vpop.f32.mrf.mxu0  ;;  %v1910_v15 = vpop.f32.mrf.mxu1 }
 0xd7a   :  { %1870 = vst [vmem:[#allocation12 + $0xe8] sm:$0xff] %v1862_v13 }
 0xd7b   :  { %v1864_v52 = vpop.f32.mrf.mxu0  ;;  %v2549_v53 = vpop.f32.mrf.mxu1 }
 0xd85   :  { %v2644_v55 = vpop.eup %2643 }
 0xd86   :  { %v1915_v3 = vpack.c.bf16 %v2644_v55, %v2644_v55 }
 0xd88   :  { %1949 = vmatmul.mubr.bf16.vlgmr.msra.gmra.mxu0 %v1915_v3 }
 0xe48   :  { %v1950_v9 = vpop.f32.mrf.mxu0 }
 0xe49   :  { %v1951_v17 = vadd.f32 %v1950_v9, %v3015_v19 }
 0xe4a   :  { %v1952_v18 = vpop.f32.mrf.mxu0 }
 0xe4b   :  { %1960 = vst [vmem:[#allocation12 + $0xf0] sm:$0xff] %v1951_v17  ;;  %v1953_v7 = vadd.f32 %v1952_v18, %v3018_v23 }
 0xe4c   :  { %v1954_v11 = vpop.f32.mrf.mxu0 }
 0xe4d   :  { %1961 = vst [vmem:[#allocation12 + $0xf8] sm:$0xff] %v1953_v7 }
 0xe4e   :  { %v1955_v41 = vpop.f32.mrf.mxu0 }
 0xe4f   :  { %2761 = shalt.err (!%p2758_p10)
}
 0xe50   :  { %s2791_s24 = smov 256   ;;  %s2792_s25 = smov 16  }
 0xe51   :  { %1974 = dma.vmem_to_hbm [thread:$0]  %s1969_s22, 4096, %s3612_s6, [#allocation6], %s2791_s24, %s2791_s24, %s2792_s25  }
 0xe52   :  { %2776 = dma.done.wait [#allocation6], 4096  }
 0xe53   :  { %2777 = vsyncadd [#allocation6], 4294963200 }
 0xe54   :  { %1978 = vsyncpa [#allocation5], 1 }
 0xe55   :  { %1979 = vsyncpa [#allocation8], 1 }
 0xe56   :  { %1980 = vsyncpa [#allocation11], 1 }
 0xe57   :  { %1981 = vsyncpa [#allocation6], 1 }

</bundles_post_ra>
